<compile_context>
chip_gen: v7x
topology: tpu7x:2x2x1
jax: 0.10.0
libtpu: 0.0.40
codegen_flags: <defaults>
</compile_context>

<pallas_src>
import functools

import jax
import jax.numpy as jnp
from jax import lax
from jax.experimental import pallas as pl
from jax.experimental.pallas import tpu as pltpu


def _mlp_block_kernel(x_ref, gamma_ref, beta_ref, w1_ref, b1_ref, w2_ref,
                      b2_ref, o_ref, *, eps: float):
    # ---- LayerNorm over the last (embedding) dim, single-pass stats, f32 ----
    x = x_ref[...].astype(jnp.float32)                         # (TM, E)
    mean = jnp.mean(x, axis=-1, keepdims=True)                 # (TM, 1)
    mean_sq = jnp.mean(x * x, axis=-1, keepdims=True)          # (TM, 1)
    var = jnp.maximum(mean_sq - mean * mean, 0.0)
    inv = lax.rsqrt(var + eps)
    xn = (x - mean) * inv * gamma_ref[...] + beta_ref[...]     # (TM, E) f32

    # ---- Linear (E -> H): bf16 operands, f32 accumulation on the MXU ----
    h = jnp.dot(xn.astype(jnp.bfloat16), w1_ref[...],
                preferred_element_type=jnp.float32)            # (TM, H) f32
    h = h + b1_ref[...]
    # nn.GELU() default is the exact (erf) formulation; keep it in f32.
    h = 0.5 * h * (1.0 + lax.erf(h * 0.7071067811865476))

    # ---- Linear (H -> E): bf16 operands, f32 accumulation ----
    y = jnp.dot(h.astype(jnp.bfloat16), w2_ref[...],
                preferred_element_type=jnp.float32)            # (TM, E) f32
    y = y + b2_ref[...]

    o_ref[...] = y.astype(o_ref.dtype)


def _pick_tm(rows: int, target: int = 512, min_blocks: int = 2) -> int:
    """Pick a row tile: multiple of 8, <= target, ideally dividing rows exactly
    with >= min_blocks blocks so the 'parallel' grid axis shards evenly across
    v7x's two TensorCores."""
    for n_blocks in range(min_blocks, rows + 1):
        if rows % n_blocks == 0:
            tm = rows // n_blocks
            if tm % 8 == 0 and tm <= target:
                return tm
    # Single full-size block if it fits cleanly.
    if rows % 8 == 0 and rows <= target:
        return rows
    # Fallback: ragged last block (Pallas masks the partial tail stores).
    return min(target, max(8, ((rows + 7) // 8) * 8))


def _vmem_budget_bytes(tm, E, H, in_itemsize, out_itemsize) -> int:
    x_io = 2 * tm * E * in_itemsize            # double-buffered input blocks
    o_io = 2 * tm * E * out_itemsize           # double-buffered output blocks
    weights = 2 * (E * H + H * E) * 2          # bf16 W1/W2 (x2 buffering)
    params = 2 * (2 * E + H + E) * 4           # gamma/beta/b1/b2 (f32)
    interm = tm * (2 * E + 2 * H) * 4          # f32 xn/h/y intermediates
    need = x_io + o_io + weights + params + interm
    # 2x slack for compiler temporaries/spills + 4 MiB headroom, 8 MiB floor.
    return max(8 << 20, 2 * need + (4 << 20))


def mlp_block(x, gamma, beta, w1, b1, w2, b2, *, eps: float = 1e-5,
              tm: int | None = None, out_dtype=None):
    """LayerNorm + MLP (Linear-GELU-Linear), eval-mode dropout. x: (B, S, E)."""
    B, S, E = x.shape
    H = w1.shape[1]
    rows = B * S
    out_dtype = x.dtype if out_dtype is None else out_dtype

    if tm is None:
        tm = _pick_tm(rows)
    n_blocks = pl.cdiv(rows, tm)

    x2d = x.reshape(rows, E)
    gamma2d = gamma.reshape(1, E).astype(jnp.float32)
    beta2d = beta.reshape(1, E).astype(jnp.float32)
    b1_2d = b1.reshape(1, H).astype(jnp.float32)
    b2_2d = b2.reshape(1, E).astype(jnp.float32)
    # Weights are passed in bf16: halves weight footprint and feeds the
    # bf16-native MXU. Accumulation stays f32 inside the kernel.
    w1_bf = w1.astype(jnp.bfloat16)
    w2_bf = w2.astype(jnp.bfloat16)

    in_itemsize = jnp.dtype(x.dtype).itemsize
    out_itemsize = jnp.dtype(out_dtype).itemsize
    cost = pl.CostEstimate(
        flops=2 * rows * E * H * 2,                 # two matmuls
        transcendentals=rows * H,                   # erf per hidden element
        bytes_accessed=int(
            rows * E * in_itemsize                  # activation read
            + rows * E * out_itemsize               # activation write
            + w1_bf.size * 2 + w2_bf.size * 2       # bf16 weights
            + (2 * E + H + E) * 4                   # LN params + biases
        ),
    )

    kernel = functools.partial(_mlp_block_kernel, eps=eps)

    out2d = pl.pallas_call(
        kernel,
        out_shape=jax.ShapeDtypeStruct((rows, E), out_dtype),
        grid_spec=pltpu.PrefetchScalarGridSpec(
            num_scalar_prefetch=0,
            grid=(n_blocks,),
            in_specs=[
                pl.BlockSpec((tm, E), lambda i: (i, 0)),   # x row block
                # Grid-invariant operands (constant index_map -> no re-DMA
                # across steps; Mosaic keeps them resident).
                pl.BlockSpec((1, E), lambda i: (0, 0)),    # LN gamma
                pl.BlockSpec((1, E), lambda i: (0, 0)),    # LN beta
                pl.BlockSpec((E, H), lambda i: (0, 0)),    # W1 (bf16)
                pl.BlockSpec((1, H), lambda i: (0, 0)),    # b1
                pl.BlockSpec((H, E), lambda i: (0, 0)),    # W2 (bf16)
                pl.BlockSpec((1, E), lambda i: (0, 0)),    # b2
            ],
            out_specs=pl.BlockSpec((tm, E), lambda i: (i, 0)),
        ),
        compiler_params=pltpu.CompilerParams(
            dimension_semantics=("parallel",),
            vmem_limit_bytes=_vmem_budget_bytes(tm, E, H, in_itemsize,
                                                out_itemsize),
        ),
        cost_estimate=cost,
    )(x2d, gamma2d, beta2d, w1_bf, b1_2d, w2_bf, b2_2d)

    return out2d.reshape(B, S, E)


def _reference(x, gamma, beta, w1, b1, w2, b2, eps=1e-5):
    xf = x.astype(jnp.float32)
    mean = jnp.mean(xf, axis=-1, keepdims=True)
    var = jnp.mean((xf - mean) ** 2, axis=-1, keepdims=True)
    xn = (xf - mean) * lax.rsqrt(var + eps) * gamma + beta
    h = xn @ w1 + b1
    h = 0.5 * h * (1.0 + lax.erf(h / jnp.sqrt(2.0)))
    return (h @ w2 + b2).astype(x.dtype)


if __name__ == "__main__":
    # Small, lane-dense shapes consistent with the module's forward:
    # x: (batch=4, seq=72, embedding_dim=128), mlp_size=256.
    # rows = 288 -> tm=144, grid=(2,): even split, no padded work.
    B, S, E, H = 4, 72, 128, 256

    key = jax.random.PRNGKey(0)
    kx, kg, kb, kw1, kb1, kw2, kb2 = jax.random.split(key, 7)

    x = jax.random.normal(kx, (B, S, E), dtype=jnp.float32)
    gamma = jnp.ones((E,), jnp.float32) + 0.01 * jax.random.normal(kg, (E,))
    beta = 0.01 * jax.random.normal(kb, (E,), dtype=jnp.float32)
    # Linear weights stored as (in_features, out_features) so y = x @ W + b.
    w1 = 0.05 * jax.random.normal(kw1, (E, H), dtype=jnp.float32)
    b1 = 0.05 * jax.random.normal(kb1, (H,), dtype=jnp.float32)
    w2 = 0.05 * jax.random.normal(kw2, (H, E), dtype=jnp.float32)
    b2 = 0.05 * jax.random.normal(kb2, (E,), dtype=jnp.float32)

    out = mlp_block(x, gamma, beta, w1, b1, w2, b2)
    out = jax.block_until_ready(out)

    ref = _reference(x, gamma, beta, w1, b1, w2, b2)
    assert out.shape == (B, S, E)
    # bf16 matmul operands (f32 accumulation) vs. a pure-f32 reference:
    # tolerance reflects bf16 operand rounding only.
    assert jnp.allclose(out, ref, atol=2e-2, rtol=2e-2), "mismatch vs reference"

    print("KERNEL_OK")
</pallas_src>

<mosaic_0001>
module attributes {stable_mosaic.version = 11 : i64} {
  func.func @_mlp_block_kernel(%arg0: i32, %arg1: memref<144x128xf32, #tpu.memory_space<vmem>>, %arg2: memref<1x128xf32, #tpu.memory_space<vmem>>, %arg3: memref<1x128xf32, #tpu.memory_space<vmem>>, %arg4: memref<128x256xbf16, #tpu.memory_space<vmem>>, %arg5: memref<1x256xf32, #tpu.memory_space<vmem>>, %arg6: memref<256x128xbf16, #tpu.memory_space<vmem>>, %arg7: memref<1x128xf32, #tpu.memory_space<vmem>>, %arg8: memref<144x128xf32, #tpu.memory_space<vmem>>) attributes {dimension_semantics = [#tpu.dimension_semantics<parallel>], iteration_bounds = array<i64: 2>, scalar_prefetch = 0 : i64, scratch_operands = 0 : i64, tpu.core_type = #tpu.core_type<tc>, window_params = [{transform_indices = @transform_0, window_bounds = array<i64: 144, 128>}, {pipeline_mode = #tpu.pipeline_mode<synchronous>, transform_indices = @transform_1, window_bounds = array<i64: 1, 128>}, {pipeline_mode = #tpu.pipeline_mode<synchronous>, transform_indices = @transform_2, window_bounds = array<i64: 1, 128>}, {pipeline_mode = #tpu.pipeline_mode<synchronous>, transform_indices = @transform_3, window_bounds = array<i64: 128, 256>}, {pipeline_mode = #tpu.pipeline_mode<synchronous>, transform_indices = @transform_4, window_bounds = array<i64: 1, 256>}, {pipeline_mode = #tpu.pipeline_mode<synchronous>, transform_indices = @transform_5, window_bounds = array<i64: 256, 128>}, {pipeline_mode = #tpu.pipeline_mode<synchronous>, transform_indices = @transform_6, window_bounds = array<i64: 1, 128>}, {transform_indices = @transform_7, window_bounds = array<i64: 144, 128>}]} {
    %c0 = arith.constant 0 : index
    %c0_0 = arith.constant 0 : index
    %0 = vector.load %arg1[%c0, %c0_0] : memref<144x128xf32, #tpu.memory_space<vmem>>, vector<144x128xf32>
    %cst = arith.constant dense<0.000000e+00> : vector<144xf32>
    %1 = vector.multi_reduction <add>, %0, %cst [1] : vector<144x128xf32> to vector<144xf32>
    %2 = vector.shape_cast %1 : vector<144xf32> to vector<144x1xf32>
    %cst_1 = arith.constant 1.280000e+02 : f32
    %3 = vector.broadcast %cst_1 : f32 to vector<144x1xf32>
    %4 = arith.divf %2, %3 : vector<144x1xf32>
    %5 = arith.mulf %0, %0 : vector<144x128xf32>
    %cst_2 = arith.constant dense<0.000000e+00> : vector<144xf32>
    %6 = vector.multi_reduction <add>, %5, %cst_2 [1] : vector<144x128xf32> to vector<144xf32>
    %7 = vector.shape_cast %6 : vector<144xf32> to vector<144x1xf32>
    %cst_3 = arith.constant 1.280000e+02 : f32
    %8 = vector.broadcast %cst_3 : f32 to vector<144x1xf32>
    %9 = arith.divf %7, %8 : vector<144x1xf32>
    %10 = arith.mulf %4, %4 : vector<144x1xf32>
    %11 = arith.subf %9, %10 : vector<144x1xf32>
    %cst_4 = arith.constant 0.000000e+00 : f32
    %12 = vector.broadcast %cst_4 : f32 to vector<144x1xf32>
    %13 = arith.maximumf %11, %12 : vector<144x1xf32>
    %cst_5 = arith.constant 9.99999974E-6 : f32
    %14 = vector.broadcast %cst_5 : f32 to vector<144x1xf32>
    %15 = arith.addf %13, %14 : vector<144x1xf32>
    %16 = math.rsqrt %15 : vector<144x1xf32>
    %17 = vector.broadcast %4 : vector<144x1xf32> to vector<144x128xf32>
    %18 = arith.subf %0, %17 : vector<144x128xf32>
    %19 = vector.broadcast %16 : vector<144x1xf32> to vector<144x128xf32>
    %20 = arith.mulf %18, %19 : vector<144x128xf32>
    %c0_6 = arith.constant 0 : index
    %c0_7 = arith.constant 0 : index
    %21 = vector.load %arg2[%c0_6, %c0_7] : memref<1x128xf32, #tpu.memory_space<vmem>>, vector<1x128xf32>
    %22 = vector.broadcast %21 : vector<1x128xf32> to vector<144x128xf32>
    %23 = arith.mulf %20, %22 : vector<144x128xf32>
    %c0_8 = arith.constant 0 : index
    %c0_9 = arith.constant 0 : index
    %24 = vector.load %arg3[%c0_8, %c0_9] : memref<1x128xf32, #tpu.memory_space<vmem>>, vector<1x128xf32>
    %25 = vector.broadcast %24 : vector<1x128xf32> to vector<144x128xf32>
    %26 = arith.addf %23, %25 : vector<144x128xf32>
    %27 = arith.truncf %26 : vector<144x128xf32> to vector<144x128xbf16>
    %c0_10 = arith.constant 0 : index
    %c0_11 = arith.constant 0 : index
    %28 = vector.load %arg4[%c0_10, %c0_11] : memref<128x256xbf16, #tpu.memory_space<vmem>>, vector<128x256xbf16>
    %cst_12 = arith.constant dense<0.000000e+00> : vector<144x256xf32>
    %29 = tpu.matmul %27, %28, %cst_12 {dimension_numbers = #tpu.dot_dimension_numbers<[1], [0], [0], [1], [0, 0, 1, 1], [], []>} : vector<144x128xbf16>, vector<128x256xbf16>, vector<144x256xf32> -> vector<144x256xf32>
    %c0_13 = arith.constant 0 : index
    %c0_14 = arith.constant 0 : index
    %30 = vector.load %arg5[%c0_13, %c0_14] : memref<1x256xf32, #tpu.memory_space<vmem>>, vector<1x256xf32>
    %31 = vector.broadcast %30 : vector<1x256xf32> to vector<144x256xf32>
    %32 = arith.addf %29, %31 : vector<144x256xf32>
    %cst_15 = arith.constant 5.000000e-01 : f32
    %33 = vector.broadcast %cst_15 : f32 to vector<144x256xf32>
    %34 = arith.mulf %33, %32 : vector<144x256xf32>
    %cst_16 = arith.constant 0.707106769 : f32
    %35 = vector.broadcast %cst_16 : f32 to vector<144x256xf32>
    %36 = arith.mulf %32, %35 : vector<144x256xf32>
    %37 = math.erf %36 : vector<144x256xf32>
    %cst_17 = arith.constant 1.000000e+00 : f32
    %38 = vector.broadcast %cst_17 : f32 to vector<144x256xf32>
    %39 = arith.addf %38, %37 : vector<144x256xf32>
    %40 = arith.mulf %34, %39 : vector<144x256xf32>
    %41 = arith.truncf %40 : vector<144x256xf32> to vector<144x256xbf16>
    %c0_18 = arith.constant 0 : index
    %c0_19 = arith.constant 0 : index
    %42 = vector.load %arg6[%c0_18, %c0_19] : memref<256x128xbf16, #tpu.memory_space<vmem>>, vector<256x128xbf16>
    %cst_20 = arith.constant dense<0.000000e+00> : vector<144x128xf32>
    %43 = tpu.matmul %41, %42, %cst_20 {dimension_numbers = #tpu.dot_dimension_numbers<[1], [0], [0], [1], [0, 0, 1, 1], [], []>} : vector<144x256xbf16>, vector<256x128xbf16>, vector<144x128xf32> -> vector<144x128xf32>
    %c0_21 = arith.constant 0 : index
    %c0_22 = arith.constant 0 : index
    %44 = vector.load %arg7[%c0_21, %c0_22] : memref<1x128xf32, #tpu.memory_space<vmem>>, vector<1x128xf32>
    %45 = vector.broadcast %44 : vector<1x128xf32> to vector<144x128xf32>
    %46 = arith.addf %43, %45 : vector<144x128xf32>
    %c0_23 = arith.constant 0 : index
    %c0_24 = arith.constant 0 : index
    %47 = vector.load %arg8[%c0_23, %c0_24] : memref<144x128xf32, #tpu.memory_space<vmem>>, vector<144x128xf32>
    tpu.vector_store %arg8[%c0_23, %c0_24], %46 {strides = array<i32>} : memref<144x128xf32, #tpu.memory_space<vmem>>, vector<144x128xf32>,
    return
  }
  func.func @transform_0(%arg0: i32) -> (i32, i32) {
    %c0_i32 = arith.constant 0 : i32
    %c0_i32_0 = arith.constant 0 : i32
    return %arg0, %c0_i32 : i32, i32
  }
  func.func @transform_1(%arg0: i32) -> (i32, i32) {
    %c0_i32 = arith.constant 0 : i32
    %c0_i32_0 = arith.constant 0 : i32
    %c0_i32_1 = arith.constant 0 : i32
    return %c0_i32, %c0_i32_0 : i32, i32
  }
  func.func @transform_2(%arg0: i32) -> (i32, i32) {
    %c0_i32 = arith.constant 0 : i32
    %c0_i32_0 = arith.constant 0 : i32
    %c0_i32_1 = arith.constant 0 : i32
    return %c0_i32, %c0_i32_0 : i32, i32
  }
  func.func @transform_3(%arg0: i32) -> (i32, i32) {
    %c0_i32 = arith.constant 0 : i32
    %c0_i32_0 = arith.constant 0 : i32
    %c0_i32_1 = arith.constant 0 : i32
    return %c0_i32, %c0_i32_0 : i32, i32
  }
  func.func @transform_4(%arg0: i32) -> (i32, i32) {
    %c0_i32 = arith.constant 0 : i32
    %c0_i32_0 = arith.constant 0 : i32
    %c0_i32_1 = arith.constant 0 : i32
    return %c0_i32, %c0_i32_0 : i32, i32
  }
  func.func @transform_5(%arg0: i32) -> (i32, i32) {
    %c0_i32 = arith.constant 0 : i32
    %c0_i32_0 = arith.constant 0 : i32
    %c0_i32_1 = arith.constant 0 : i32
    return %c0_i32, %c0_i32_0 : i32, i32
  }
  func.func @transform_6(%arg0: i32) -> (i32, i32) {
    %c0_i32 = arith.constant 0 : i32
    %c0_i32_0 = arith.constant 0 : i32
    %c0_i32_1 = arith.constant 0 : i32
    return %c0_i32, %c0_i32_0 : i32, i32
  }
  func.func @transform_7(%arg0: i32) -> (i32, i32) {
    %c0_i32 = arith.constant 0 : i32
    %c0_i32_0 = arith.constant 0 : i32
    return %arg0, %c0_i32 : i32, i32
  }
}

</mosaic_0001>

<bundles_post_ra>
// kernel: tpu_custom_call.1
= control target key start
LH: loop header
LB: loop body
LE: loop exit
PB: predicated region body
PF: predicated region fallthrough
CT: control target
= control target key end

     0   :  { %s2660_s0 = inlined_call_operand.hbm [shape: f32[288,128], index: 0, kind: input, shape index: {}]   ;;  %s2661_s1 = inlined_call_operand.vmem [shape: f32[1,128], index: 1, kind: input, shape index: {}]   ;;  %s2662_s2 = inlined_call_operand.vmem [shape: f32[1,128], index: 2, kind: input, shape index: {}]   ;;  %s2663_s3 = inlined_call_operand.hbm [shape: bf16[128,256], index: 3, kind: input, shape index: {}]   ;;  %s2664_s4 = inlined_call_operand.vmem [shape: f32[1,256], index: 4, kind: input, shape index: {}]   ;;  %s2665_s5 = inlined_call_operand.hbm [shape: bf16[256,128], index: 5, kind: input, shape index: {}]   ;;  %s2666_s6 = inlined_call_operand.vmem [shape: f32[1,128], index: 6, kind: input, shape index: {}]   ;;  %s2667_s7 = inlined_call_operand.hbm [shape: f32[288,128], index: 7, kind: output, shape index: {}]  }
   0x1   :  { %2673 = sst [smem:[#allocation12_spill]] %s2663_s3 }
   0x2   :  { %12 = vsyncpa [#allocation3], 0 }
   0x3   :  { %14 = vsyncpa [#allocation3 + $0x1], 0 }
   0x4   :  { %15 = vsyncpa [#allocation6], 0 }
   0x5   :  { %16 = vsyncpa [#allocation4], 0 }
   0x6   :  { %18 = vsyncpa [#allocation4 + $0x1], 0  ;;  %s2004_s24 = smov 0   ;;  %s2006_s25 = smov 0  }
   0x7   :  { %s2008_s26 = smov 0   ;;  %s2010_s27 = smov 0  }
   0x8 LB: > { %s2025_s28 = sadd.s32 4294967295, %s1951_s27   ;;  %s1452_s29 = sadd.s32 4294967294, %s1951_s27   ;;  %s1951_s27 = sphi %s2010_s27, %s2693_s27   ;;  %s1947_s26 = sphi %s2008_s26, %s2692_s26   ;;  %s1943_s25 = sphi %s2006_s25, %s2691_s25   ;;  %s1939_s24 = sphi %s2004_s24, %s2690_s24  }
   0x9   : > { %p44_p0 = scmp.ne.s32.totalorder %s1943_s25, %s1939_s24  ;;  %p2668_p1 = scmp.eq.s32.totalorder %s2025_s28, 0 }
   0xa   : > { %p200_p3 = scmp.eq.s32.totalorder %s1452_s29, 1  ;;  %p1453_p5 = scmp.ge.s32.totalorder %s1951_s27, 1 }
   0xb   : > { %p2034_p4 = por %p2668_p1, %p44_p0  ;;  %p207_p7 = scmp.lt.s32.totalorder %s1951_s27, 3 }
   0xc   : > { %p2039_p6 = por %p200_p3, %p44_p0  ;;  %s1953_s10 = smov [#allocation5]  }
   0xd   : > { %s2674_s30 = scalar_select %p2034_p4, 1, 0 }
   0xe   : > { %s2675_s8 = scalar_select %p2039_p6, 1, 0 }
   0xf   : > { %p2044_p8 = pnand %p1453_p5, %p207_p7  ;;  %s225_s11 = sshll.u32 %s1953_s10, 4  ;;  %s2048_s11 = int_to_ptr.vmem [resolvable:$true] %s225_s11 }
  0x10   : > { %s1954_s13 = smov [#allocation7]   ;;  %s2678_s3 = sld [smem:[#allocation12_spill]] }
  0x11   : > { %p1585_p9 = pneg %p2044_p8  ;;  %s241_s14 = sshll.u32 %s1954_s13, 4  ;;  %s2059_s14 = int_to_ptr.vmem [resolvable:$true] %s241_s14 }
  0x13   : > { %p2055_p11 = pnand %p1585_p9, %p2668_p1 }
  0x15   : > { %p1797_p13 = pneg %p2055_p11 }
  0x16   : > { %s1795_s17 = scalar_lea.hbm %s2678_s3, 2048 }
  0x17   : > { %p1796_p12 = scmp.ne.s32.totalorder %s2678_s3, %s1795_s17  ;;  %p1802_p5 = scmp.lt.u32.totalorder %s1795_s17, %s2678_s3 }
  0x19   : > { %p1798_p0 = pnand %p1797_p13, %p1796_p12 }
  0x1b   : > { %p1799_p3 = pneg %p1798_p0 }
  0x1d   : > { %p1804_p7 = pnand %p1802_p5, %p1799_p3 }
  0x1f   : > { %1807 = shalt.err (!%p1804_p7)
}
  0x20   : > { %s1808_s22 = scalar_lea.vmem %s2048_s11, 2048  ;;  %p1816_p2 = scmp.lt.s32.totalorder %s2048_s11, %s2048_s11 }
  0x21   : > { %p1809_p9 = scmp.ne.s32.totalorder %s2048_s11, %s1808_s22  ;;  %p1817_p12 = scmp.lt.s32.totalorder %s1808_s22, %s1808_s22 }
  0x23   : > { %p1811_p10 = pnand %p1809_p9, %p1797_p13  ;;  %p1818_p0 = por %p1817_p12, %p1816_p2 }
  0x25   : > { %p1812_p1 = pneg %p1811_p10 }
  0x27   : > { %p1819_p6 = pnand %p1818_p0, %p1812_p1 }
  0x29   : > { %1822 = shalt.err (!%p1819_p6)
}
  0x2a   : > { %s2669_s23 = smov 128   ;;  %s2670_s29 = smov 8  }
  0x2b   : > { %1588 = dma.hbm_to_vmem [thread:$0]  (!%p2055_p11), %s2678_s3, 2048, %s2048_s11, [#allocation6], %s2669_s23, %s2669_s23, %s2670_s29  }
  0x2c   : > { %s1823_s17 = scalar_lea.hbm %s2665_s5, 2048 }
  0x2d   : > { %p1824_p1 = scmp.ne.s32.totalorder %s2665_s5, %s1823_s17  ;;  %p1830_p10 = scmp.lt.u32.totalorder %s1823_s17, %s2665_s5 }
  0x2f   : > { %p1826_p2 = pnand %p1824_p1, %p1797_p13 }
  0x31   : > { %p1827_p6 = pneg %p1826_p2 }
  0x33   : > { %p1832_p3 = pnand %p1830_p10, %p1827_p6 }
  0x35   : > { %1835 = shalt.err (!%p1832_p3)
}
  0x36   : > { %s1836_s11 = scalar_lea.vmem %s2059_s14, 2048  ;;  %p1844_p12 = scmp.lt.s32.totalorder %s2059_s14, %s2059_s14 }
  0x37   : > { %p1837_p5 = scmp.ne.s32.totalorder %s2059_s14, %s1836_s11  ;;  %p1845_p0 = scmp.lt.s32.totalorder %s1836_s11, %s1836_s11 }
  0x39   : > { %p1839_p7 = pnand %p1837_p5, %p1797_p13  ;;  %p1846_p1 = por %p1845_p0, %p1844_p12 }
  0x3b   : > { %p1840_p9 = pneg %p1839_p7 }
  0x3d   : > { %p1847_p2 = pnand %p1846_p1, %p1840_p9 }
  0x3f   : > { %1850 = shalt.err (!%p1847_p2)
}
  0x40   : > { %s1957_s22 = smov 64   ;;  %s1958_s10 = smov 4  }
  0x41   : > { %1591 = dma.hbm_to_vmem [thread:$0]  (!%p2055_p11), %s2665_s5, 2048, %s2059_s14, [#allocation6], %s1957_s22, %s1957_s22, %s1958_s10  }
  0x42   : > { %s2117_s16 = sadd.s32 1, %s1951_s27   ;;  %s31_s18 = sadd.s32 1, %s1947_s26 }
  0x43   : > { %s28_s17 = ssub.s32 %s1951_s27, %s2117_s16  ;;  %p38_p6 = scmp.ne.s32.totalorder %s1947_s26, %s1943_s25 }
  0x44   : > { %p29_p13 = scmp.eq.s32.totalorder %s28_s17, 0  ;;  %p39_p10 = scmp.eq.s32.totalorder %s1951_s27, 0 }
  0x45   : > { %p2679_p5 = scmp.eq.s32.totalorder %s2025_s28, 1  ;;  %p1602_p9 = scmp.lt.s32.totalorder %s1951_s27, 2 }
  0x46   : > { %s2126_s19 = scalar_select %p29_p13, %s1947_s26, %s31_s18  }
  0x47   : > { %p40_p3 = por %p39_p10, %p38_p6  ;;  %p2130_p7 = por %p2679_p5, %p38_p6 }
  0x48   : > { %s258_s12 = sand.u32 1, %s1947_s26   ;;  %s1499_s14 = smul.u32 2304, %s1951_s27 }
  0x49   : > { %s2680_s20 = scalar_select %p2130_p7, 1, 0 }
  0x4a   : > { %s1571_s21 = smul.u32 144, %s258_s12  ;;  %p2137_p11 = pnand %p1602_p9, %p40_p3 }
  0x4b   : > { %s2144_s13 = scalar_lea.hbm %s2660_s0, %s1499_s14  ;;  %s2148_s18 = scalar_lea.sflag [#allocation3], %s258_s12 }
  0x4c   : > { %s262_s15 = scalar_lea.vmem [#allocation2], %s1571_s21  ;;  %s1851_s23 = scalar_lea.hbm %s2144_s13, 2304 }
  0x4d   : > { %s269_s17 = sshll.u32 %s262_s15, 4  ;;  %p1852_p12 = scmp.ne.s32.totalorder %s2144_s13, %s1851_s23  ;;  %s2146_s17 = int_to_ptr.vmem [resolvable:$true] %s269_s17 }
  0x4e   : > { %p1853_p0 = pneg %p2137_p11  ;;  %s1856_s10 = scalar_lea.hbm %s2660_s0, 4608 }
  0x4f   : > { %p1857_p13 = scmp.lt.u32.totalorder %s2144_s13, %s2660_s0  ;;  %p1858_p6 = scmp.lt.u32.totalorder %s1856_s10, %s1851_s23 }
  0x50   : > { %p1854_p1 = pnand %p1853_p0, %p1852_p12  ;;  %p1860_p3 = scmp.lt.u32.totalorder %s1851_s23, %s2144_s13 }
  0x51   : > { %p1859_p10 = por %p1858_p6, %p1857_p13 }
  0x52   : > { %p1855_p2 = pneg %p1854_p1 }
  0x53   : > { %p1861_p5 = por %p1860_p3, %p1859_p10 }
  0x55   : > { %p1862_p9 = pnand %p1861_p5, %p1855_p2 }
  0x57   : > { %1865 = shalt.err (!%p1862_p9)
}
  0x58   : > { %s1866_s12 = scalar_lea.vmem %s2146_s17, 2304  ;;  %s1959_s21 = smov [#allocation2]  }
  0x59   : > { %p1867_p12 = scmp.ne.s32.totalorder %s2146_s17, %s1866_s12  ;;  %s1871_s15 = sshll.u32 %s1959_s21, 4  ;;  %s1872_s15 = int_to_ptr.vmem [resolvable:$false] %s1871_s15 }
  0x5a   : > { %s1873_s3 = scalar_lea.vmem %s1872_s15, 4608  ;;  %p1874_p4 = scmp.lt.s32.totalorder %s2146_s17, %s1872_s15 }
  0x5b   : > { %p1869_p1 = pnand %p1867_p12, %p1853_p0  ;;  %p1875_p13 = scmp.lt.s32.totalorder %s1873_s3, %s1866_s12 }
  0x5d   : > { %p1870_p7 = pneg %p1869_p1  ;;  %p1876_p6 = por %p1875_p13, %p1874_p4 }
  0x5f   : > { %p1877_p10 = pnand %p1876_p6, %p1870_p7 }
  0x61   : > { %1880 = shalt.err (!%p1877_p10)
}
  0x62   : > { %s2682_s23 = smov 8   ;;  %s2683_s29 = smov 128  }
  0x63   : > { %1595 = dma.hbm_to_vmem [thread:$0]  (!%p2137_p11), %s2144_s13, 2304, %s2146_s17, %s2148_s18, %s2683_s29, %s2683_s29, %s2682_s23  }
  0x64   : > { %281 = sbr.rel (%p2044_p8) target bundleno = 822 (0x336), region = 48  ;;  %s2182_s14 = sand.u32 (!%p2044_p8), 1, %s1943_s25  }
  0x65   : > { %s1572_s22 = smul.u32 (!%p2044_p8), 144, %s2182_s14  ;;  %s284_s10 = scalar_lea.sflag (!%p2044_p8), [#allocation3], %s2182_s14 }
  0x66   : > { %p2684_p4 = scmp.ne.s32.totalorder (!%p2044_p8), %s2674_s30, 0 }
  0x67   : > { %s2188_s11 = scalar_lea.vmem (!%p2044_p8), [#allocation2], %s1572_s22 }
  0x6b   : > { %1926 = dma.done.wait (%p2684_p4), %s284_s10, 2304  }
  0x6c   : > { %1928 = vsyncadd (%p2684_p4), %s284_s10, 4294964992  ;;  %p2685_p7 = scmp.eq.s32.totalorder %s2025_s28, 0 }
  0x6e   : > { %1930 = dma.done.wait (%p2685_p7), [#allocation6], 4096   ;;  %p2686_p8 = pmov %p2685_p7 }
  0x6f   : > { %v2199_v0 = vld [vmem:[%s2188_s11] sm:$0xff]  ;;  %v2202_v1 = vld [vmem:[%s2188_s11 + $0x8] sm:$0xff]  ;;  %v2211_v4 = vld [vmem:[%s2188_s11 + $0x10] sm:$0xff]  ;;  %v1960_v42 = vmov 0   ;;  %s2572_s3 = scalar_lea.vmem [#allocation8], %s1572_s22  ;;  %s1500_s23 = smul.u32 2304, %s2025_s28 }
  0x70   : > { %1932 = vsyncadd (%p2686_p8), [#allocation6], 4294963200  ;;  %347 = vadd.xlane.f32.xlu0 %v2199_v0  ;;  %v402_v2 = vmul.f32 %v2199_v0, %v2199_v0  ;;  %v403_v3 = vmul.f32 %v2202_v1, %v2202_v1  ;;  %v2214_v5 = vld [vmem:[%s2188_s11 + $0x18] sm:$0xff]  ;;  %v404_v6 = vmul.f32 %v2211_v4, %v2211_v4  ;;  %v2223_v8 = vld [vmem:[%s2188_s11 + $0x20] sm:$0xff]  ;;  %799 = vmatprep.mubr.bf16.mxu0 %v1960_v42  ;;  %s1360_s29 = sshll.u32 %s2572_s3, 4  ;;  %s1347_s28 = scalar_lea.sflag [#allocation4], %s2182_s14  ;;  %s2613_s29 = int_to_ptr.vmem [resolvable:$true] %s1360_s29 }
  0x71   : > { %v405_v7 = vmul.f32 %v2214_v5, %v2214_v5  ;;  %v2226_v9 = vld [vmem:[%s2188_s11 + $0x28] sm:$0xff]  ;;  %v406_v12 = vmul.f32 %v2223_v8, %v2223_v8  ;;  %v2235_v16 = vld [vmem:[%s2188_s11 + $0x30] sm:$0xff]  ;;  %v2238_v18 = vld [vmem:[%s2188_s11 + $0x38] sm:$0xff]  ;;  %s1881_s30 = scalar_lea.vmem %s2613_s29, 2304  ;;  %p2687_p0 = scmp.ne.s32.totalorder %s2680_s20, 0 }
  0x72   : > { %420 = vadd.xlane.f32.xlu1 %v402_v2  ;;  %v1647_v10 = vld [vmem:[#allocation5 + $0x4] ss:$8 sps:$4 sm:$0xff]   ;;  %v1649_v11 = vld [vmem:[#allocation5] ss:$8 sps:$4 sm:$0xff]   ;;  %v1650_v13 = vld [vmem:[#allocation5 + $0x14] ss:$8 sps:$4 sm:$0xff]   ;;  %v407_v14 = vmul.f32 %v2226_v9, %v2226_v9  ;;  %v408_v20 = vmul.f32 %v2235_v16, %v2235_v16  ;;  %v409_v21 = vmul.f32 %v2238_v18, %v2238_v18  ;;  %p1882_p11 = scmp.ne.s32.totalorder %s2613_s29, %s1881_s30 }
  0x73   : > { %767 = vmatprep.subr.bf16.mxu0 %v1647_v10  ;;  %v1652_v15 = vld [vmem:[#allocation5 + $0x10] ss:$8 sps:$4 sm:$0xff]   ;;  %v1653_v17 = vld [vmem:[#allocation5 + $0x24] ss:$8 sps:$4 sm:$0xff]   ;;  %v1655_v19 = vld [vmem:[#allocation5 + $0x20] ss:$8 sps:$4 sm:$0xff]  }
  0x74   : > { %349 = vadd.xlane.f32.xlu0 %v2202_v1  ;;  %768 = vmatpush1.bf16.msra.mxu0 %v1649_v11  ;;  %v1656_v22 = vld [vmem:[#allocation5 + $0x34] ss:$8 sps:$4 sm:$0xff]   ;;  %v1658_v23 = vld [vmem:[#allocation5 + $0x30] ss:$8 sps:$4 sm:$0xff]   ;;  %v1659_v25 = vld [vmem:[#allocation5 + $0x44] ss:$8 sps:$4 sm:$0xff]   ;;  %p1883_p2 = pnand %p1882_p11, %p2687_p0 }
  0x75   : > { %769 = vmatprep.subr.bf16.mxu0 %v1650_v13  ;;  %v2247_v24 = vld [vmem:[%s2188_s11 + $0x40] sm:$0xff]  ;;  %v2250_v26 = vld [vmem:[%s2188_s11 + $0x48] sm:$0xff]  ;;  %v2259_v32 = vld [vmem:[%s2188_s11 + $0x50] sm:$0xff]  ;;  %s1961_s9 = smov [#allocation8]  }
  0x76   : > { %422 = vadd.xlane.f32.xlu1 %v403_v3  ;;  %v1661_v27 = vld [vmem:[#allocation5 + $0x40] ss:$8 sps:$4 sm:$0xff]   ;;  %v410_v28 = vmul.f32 %v2247_v24, %v2247_v24  ;;  %v411_v29 = vmul.f32 %v2250_v26, %v2250_v26  ;;  %v1662_v30 = vld [vmem:[#allocation5 + $0x54] ss:$8 sps:$4 sm:$0xff]   ;;  %v1664_v31 = vld [vmem:[#allocation5 + $0x50] ss:$8 sps:$4 sm:$0xff]   ;;  %v412_v36 = vmul.f32 %v2259_v32, %v2259_v32  ;;  %p1884_p3 = pneg %p1883_p2 }
  0x77   : > { %v1665_v33 = vld [vmem:[#allocation5 + $0x64] ss:$8 sps:$4 sm:$0xff]   ;;  %v1667_v35 = vld [vmem:[#allocation5 + $0x60] ss:$8 sps:$4 sm:$0xff]   ;;  %v1668_v38 = vld [vmem:[#allocation5 + $0x74] ss:$8 sps:$4 sm:$0xff]  }
  0x78   : > { %351 = vadd.xlane.f32.xlu0 %v2211_v4  ;;  %770 = vmatpush1.bf16.msra.mxu0 %v1652_v15  ;;  %v2262_v34 = vld [vmem:[%s2188_s11 + $0x58] sm:$0xff]  ;;  %v2271_v40 = vld [vmem:[%s2188_s11 + $0x60] sm:$0xff]  ;;  %v2274_v41 = vld [vmem:[%s2188_s11 + $0x68] sm:$0xff]  ;;  %s1885_s13 = sshll.u32 %s1961_s9, 4  ;;  %s1886_s13 = int_to_ptr.vmem [resolvable:$false] %s1885_s13 }
  0x79   : > { %771 = vmatprep.subr.bf16.mxu0 %v1653_v17  ;;  %v413_v37 = vmul.f32 %v2262_v34, %v2262_v34  ;;  %v1670_v39 = vld [vmem:[#allocation5 + $0x70] ss:$8 sps:$4 sm:$0xff]   ;;  %v414_v43 = vmul.f32 %v2271_v40, %v2271_v40  ;;  %v415_v44 = vmul.f32 %v2274_v41, %v2274_v41  ;;  %v1671_v53 = vld [vmem:[#allocation7 + $0x40] sm:$0xff]   ;;  %v1673_v55 = vld [vmem:[#allocation7 + $0x48] sm:$0xff]   ;;  %s1887_s17 = scalar_lea.vmem %s1886_s13, 4608  ;;  %p1888_p5 = scmp.lt.s32.totalorder %s2613_s29, %s1886_s13 }
  0x7a   : > { %353 = vadd.xlane.f32.xlu1 %v2214_v5  ;;  %v2284_v45 = vld [vmem:[%s2188_s11 + $0x70] sm:$0xff]  ;;  %v2287_v46 = vld [vmem:[%s2188_s11 + $0x78] sm:$0xff]  ;;  %v2296_v49 = vld [vmem:[%s2188_s11 + $0x80] sm:$0xff]  ;;  %1501 = vmatprep.subr.bf16.mxu1 %v1671_v53  ;;  %p1889_p9 = scmp.lt.s32.totalorder %s1887_s17, %s1881_s30 }
  0x7b   : > { %v416_v47 = vmul.f32 %v2284_v45, %v2284_v45  ;;  %v417_v48 = vmul.f32 %v2287_v46, %v2287_v46  ;;  %v2299_v50 = vld [vmem:[%s2188_s11 + $0x88] sm:$0xff]  ;;  %v418_v51 = vmul.f32 %v2296_v49, %v2296_v49  ;;  %v1672_v54 = vld [vmem:[#allocation7] sm:$0xff]   ;;  %s2611_s11 = scalar_lea.hbm %s2667_s7, %s1500_s23 }
  0x7c   : > { %424 = vadd.xlane.f32.xlu0 %v404_v6  ;;  %772 = vmatpush1.bf16.msra.mxu0 %v1655_v19  ;;  %v419_v52 = vmul.f32 %v2299_v50, %v2299_v50  ;;  %v1674_v56 = vld [vmem:[#allocation7 + $0x8] sm:$0xff]   ;;  %p1890_p12 = por %p1889_p9, %p1888_p5 }
  0x7d   : > { %773 = vmatprep.subr.bf16.mxu0 %v1656_v22  ;;  %1502 = vmatpush3.bf16.msra.mxu1 %v1672_v54 }
  0x7e   : > { %426 = vadd.xlane.f32.xlu1 %v405_v7  ;;  %1503 = vmatprep.subr.bf16.mxu1 %v1673_v55  ;;  %p1891_p1 = pnand %p1890_p12, %p1884_p3 }
  0x80   : > { %355 = vadd.xlane.f32.xlu0 %v2223_v8  ;;  %774 = vmatpush1.bf16.msra.mxu0 %v1658_v23 }
  0x81   : > { %775 = vmatprep.subr.bf16.mxu0 %v1659_v25  ;;  %1504 = vmatpush3.bf16.msra.mxu1 %v1674_v56 }
  0x82   : > { %357 = vadd.xlane.f32.xlu1 %v2226_v9 }
  0x84   : > { %428 = vadd.xlane.f32.xlu0 %v406_v12  ;;  %776 = vmatpush1.bf16.msra.mxu0 %v1661_v27 }
  0x85   : > { %777 = vmatprep.subr.bf16.mxu0 %v1662_v30 }
  0x86   : > { %430 = vadd.xlane.f32.xlu1 %v407_v14 }
  0x88   : > { %359 = vadd.xlane.f32.xlu0 %v2235_v16  ;;  %778 = vmatpush1.bf16.msra.mxu0 %v1664_v31 }
  0x89   : > { %779 = vmatprep.subr.bf16.mxu0 %v1665_v33 }
  0x8a   : > { %361 = vadd.xlane.f32.xlu1 %v2238_v18 }
  0x8c   : > { %432 = vadd.xlane.f32.xlu0 %v408_v20  ;;  %780 = vmatpush1.bf16.msra.mxu0 %v1667_v35 }
  0x8d   : > { %781 = vmatprep.subr.bf16.mxu0 %v1668_v38 }
  0x8e   : > { %434 = vadd.xlane.f32.xlu1 %v409_v21 }
  0x90   : > { %363 = vadd.xlane.f32.xlu0 %v2247_v24  ;;  %782 = vmatpush1.bf16.msra.mxu0 %v1670_v39 }
  0x92   : > { %365 = vadd.xlane.f32.xlu1 %v2250_v26 }
  0x94   : > { %436 = vadd.xlane.f32.xlu0 %v410_v28 }
  0x96   : > { %438 = vadd.xlane.f32.xlu1 %v411_v29 }
  0x98   : > { %367 = vadd.xlane.f32.xlu0 %v2259_v32 }
  0x9a   : > { %369 = vadd.xlane.f32.xlu1 %v2262_v34 }
  0x9c   : > { %440 = vadd.xlane.f32.xlu0 %v412_v36 }
  0x9e   : > { %442 = vadd.xlane.f32.xlu1 %v413_v37 }
  0xa0   : > { %371 = vadd.xlane.f32.xlu0 %v2271_v40 }
  0xa2   : > { %373 = vadd.xlane.f32.xlu1 %v2274_v41 }
  0xa4   : > { %444 = vadd.xlane.f32.xlu0 %v414_v43 }
  0xa6   : > { %446 = vadd.xlane.f32.xlu1 %v415_v44 }
  0xa8   : > { %375 = vadd.xlane.f32.xlu0 %v2284_v45 }
  0xaa   : > { %377 = vadd.xlane.f32.xlu1 %v2287_v46 }
  0xac   : > { %448 = vadd.xlane.f32.xlu0 %v416_v47 }
  0xae   : > { %450 = vadd.xlane.f32.xlu1 %v417_v48 }
  0xb0   : > { %379 = vadd.xlane.f32.xlu0 %v2296_v49 }
  0xb2   : > { %381 = vadd.xlane.f32.xlu1 %v2299_v50 }
  0xb4   : > { %452 = vadd.xlane.f32.xlu0 %v418_v51 }
  0xb6   : > { %454 = vadd.xlane.f32.xlu1 %v419_v52 }
  0xfd   : > { %v348_v57 = vpop.xlane.xlu0 %347 }
  0xfe   : > { %v384_v58 = vmul.f32 0.0078125, %v348_v57 }
  0xff   : > { %v421_v59 = vpop.xlane.xlu1 %420 }
 0x100   : > { %v474_v60 = vmul.f32 %v384_v58, %v384_v58  ;;  %v456_v61 = vmul.f32 0.0078125, %v421_v59  ;;  %v564_v43 = vsub.f32 %v2199_v0, %v384_v58  ;;  %v2327_v59 = vld [vmem:[%s2661_s1] ss:$0 sm:$0xff] }
 0x101   : > { %v350_v62 = vpop.xlane.xlu0 %349 }
 0x102   : > { %v492_v63 = vsub.f32 %v456_v61, %v474_v60  ;;  %v385_v2 = vmul.f32 0.0078125, %v350_v62 }
 0x103   : > { %v423_v3 = vpop.xlane.xlu1 %422 }
 0x104   : > { %v510_v6 = vmax.f32 %v492_v63, 0.0  ;;  %v475_v7 = vmul.f32 %v385_v2, %v385_v2  ;;  %v457_v10 = vmul.f32 0.0078125, %v423_v3  ;;  %v565_v0 = vsub.f32 %v2202_v1, %v385_v2 }
 0x105   : > { %v352_v11 = vpop.xlane.xlu0 %351 }
 0x106   : > { %v528_v12 = vadd.f32 1e-05, %v510_v6  ;;  %v493_v13 = vsub.f32 %v457_v10, %v475_v7  ;;  %v2307_v14 = vmul.f32 0.0078125, %v352_v11 }
 0x107   : > { %v354_v15 = vpop.xlane.xlu1 %353 }
 0x108   : > { %1687 = vrsqrt.f32 %v528_v12  ;;  %v511_v17 = vmax.f32 %v493_v13, 0.0  ;;  %v476_v19 = vmul.f32 %v2307_v14, %v2307_v14  ;;  %v2311_v20 = vmul.f32 0.0078125, %v354_v15  ;;  %v2338_v13 = vld [vmem:[%s2662_s2] ss:$0 sm:$0xff] }
 0x109   : > { %v425_v21 = vpop.xlane.xlu0 %424 }
 0x10a   : > { %v529_v22 = vadd.f32 1e-05, %v511_v17  ;;  %v458_v23 = vmul.f32 0.0078125, %v425_v21  ;;  %v477_v27 = vmul.f32 %v2311_v20, %v2311_v20  ;;  %v566_v21 = vsub.f32 %v2211_v4, %v2307_v14 }
 0x10b   : > { %v427_v25 = vpop.xlane.xlu1 %426 }
 0x10c   : > { %1689 = vrsqrt.f32 %v529_v22  ;;  %v494_v28 = vsub.f32 %v458_v23, %v476_v19  ;;  %v459_v29 = vmul.f32 0.0078125, %v427_v25 }
 0x10d   : > { %v356_v30 = vpop.xlane.xlu0 %355 }
 0x10e   : > { %v512_v31 = vmax.f32 %v494_v28, 0.0  ;;  %v495_v33 = vsub.f32 %v459_v29, %v477_v27  ;;  %v2315_v35 = vmul.f32 0.0078125, %v356_v30 }
 0x10f   : > { %v358_v36 = vpop.xlane.xlu1 %357 }
 0x110   : > { %v530_v37 = vadd.f32 1e-05, %v512_v31  ;;  %v513_v38 = vmax.f32 %v495_v33, 0.0  ;;  %v478_v39 = vmul.f32 %v2315_v35, %v2315_v35  ;;  %v2320_v44 = vmul.f32 0.0078125, %v358_v36 }
 0x111   : > { %v429_v47 = vpop.xlane.xlu0 %428  ;;  %v567_v31 = vsub.f32 %v2214_v5, %v2311_v20 }
 0x112   : > { %v1688_v48 = vpop.eup %1687  ;;  %1691 = vrsqrt.f32 %v530_v37  ;;  %v531_v51 = vadd.f32 1e-05, %v513_v38  ;;  %v460_v52 = vmul.f32 0.0078125, %v429_v47  ;;  %v479_v55 = vmul.f32 %v2320_v44, %v2320_v44 }
 0x113   : > { %v431_v53 = vpop.xlane.xlu1 %430  ;;  %v582_v54 = vmul.f32 %v1688_v48, %v564_v43 }
 0x114   : > { %1693 = vrsqrt.f32 %v531_v51  ;;  %v496_v56 = vsub.f32 %v460_v52, %v478_v39  ;;  %v461_v57 = vmul.f32 0.0078125, %v431_v53 }
 0x115   : > { %v360_v58 = vpop.xlane.xlu0 %359  ;;  %v607_v7 = vmul.f32 %v2327_v59, %v582_v54 }
 0x116   : > { %v1690_v60 = vpop.eup %1689  ;;  %v514_v61 = vmax.f32 %v496_v56, 0.0  ;;  %v497_v62 = vsub.f32 %v461_v57, %v479_v55  ;;  %v2330_v63 = vmul.f32 0.0078125, %v360_v58  ;;  %v568_v57 = vsub.f32 %v2223_v8, %v2315_v35 }
 0x117   : > { %v362_v3 = vpop.xlane.xlu1 %361  ;;  %v583_v6 = vmul.f32 %v1690_v60, %v565_v0  ;;  %v632_v23 = vadd.f32 %v2338_v13, %v607_v7  ;;  %v569_v7 = vsub.f32 %v2226_v9, %v2320_v44 }
 0x118   : > { %v532_v10 = vadd.f32 1e-05, %v514_v61  ;;  %v515_v11 = vmax.f32 %v497_v62, 0.0  ;;  %v480_v12 = vmul.f32 %v2330_v63, %v2330_v63  ;;  %v2340_v1 = vmul.f32 0.0078125, %v362_v3 }
 0x119   : > { %v433_v2 = vpop.xlane.xlu0 %432  ;;  %v608_v15 = vmul.f32 %v2327_v59, %v583_v6 }
 0x11a   : > { %1695 = vrsqrt.f32 %v532_v10  ;;  %v533_v17 = vadd.f32 1e-05, %v515_v11  ;;  %v462_v19 = vmul.f32 0.0078125, %v433_v2  ;;  %v481_v28 = vmul.f32 %v2340_v1, %v2340_v1 }
 0x11b   : > { %v435_v22 = vpop.xlane.xlu1 %434  ;;  %v633_v25 = vadd.f32 %v2338_v13, %v608_v15 }
 0x11c   : > { %v1692_v27 = vpop.eup %1691  ;;  %1697 = vrsqrt.f32 %v533_v17  ;;  %v498_v29 = vsub.f32 %v462_v19, %v480_v12  ;;  %v463_v30 = vmul.f32 0.0078125, %v435_v22 }
 0x11d   : > { %v364_v33 = vpop.xlane.xlu0 %363  ;;  %v650_v36 = vpack.c.bf16 %v633_v25, %v632_v23  ;;  %v584_v37 = vmul.f32 %v1692_v27, %v566_v21 }
 0x11e   : > { %v1694_v38 = vpop.eup %1693  ;;  %v516_v4 = vmax.f32 %v498_v29, 0.0  ;;  %v499_v14 = vsub.f32 %v463_v30, %v481_v28  ;;  %v2351_v39 = vmul.f32 0.0078125, %v364_v33  ;;  %v570_v30 = vsub.f32 %v2235_v16, %v2330_v63 }
 0x11f   : > { %800 = vmatmul.mubr.bf16.vlgmr.msra.gmra.mrb[0].mxu0 %v650_v36  ;;  %v366_v43 = vpop.xlane.xlu1 %365  ;;  %v585_v47 = vmul.f32 %v1694_v38, %v567_v31  ;;  %v609_v48 = vmul.f32 %v2327_v59, %v584_v37 }
 0x120   : > { %v534_v51 = vadd.f32 1e-05, %v516_v4  ;;  %v517_v52 = vmax.f32 %v499_v14, 0.0  ;;  %v482_v53 = vmul.f32 %v2351_v39, %v2351_v39  ;;  %809 = vmatprep.mubr.bf16.mxu0 %v1960_v42  ;;  %v2357_v5 = vmul.f32 0.0078125, %v366_v43 }
 0x121   : > { %v437_v20 = vpop.xlane.xlu0 %436  ;;  %v610_v54 = vmul.f32 %v2327_v59, %v585_v47  ;;  %v634_v58 = vadd.f32 %v2338_v13, %v609_v48  ;;  %v571_v43 = vsub.f32 %v2238_v18, %v2340_v1 }
 0x122   : > { %1699 = vrsqrt.f32 %v534_v51  ;;  %v535_v55 = vadd.f32 1e-05, %v517_v52  ;;  %v464_v56 = vmul.f32 0.0078125, %v437_v20  ;;  %v483_v62 = vmul.f32 %v2357_v5, %v2357_v5 }
 0x123   : > { %v439_v0 = vpop.xlane.xlu1 %438  ;;  %v635_v60 = vadd.f32 %v2338_v13, %v610_v54 }
 0x124   : > { %v1696_v61 = vpop.eup %1695  ;;  %1701 = vrsqrt.f32 %v535_v55  ;;  %v500_v3 = vsub.f32 %v464_v56, %v482_v53  ;;  %v465_v6 = vmul.f32 0.0078125, %v439_v0 }
 0x125   : > { %v368_v10 = vpop.xlane.xlu0 %367  ;;  %v651_v11 = vpack.c.bf16 %v635_v60, %v634_v58  ;;  %v586_v12 = vmul.f32 %v1696_v61, %v568_v57 }
 0x126   : > { %v1698_v2 = vpop.eup %1697  ;;  %v518_v8 = vmax.f32 %v500_v3, 0.0  ;;  %v501_v35 = vsub.f32 %v465_v6, %v483_v62  ;;  %v2368_v15 = vmul.f32 0.0078125, %v368_v10  ;;  %v572_v62 = vsub.f32 %v2247_v24, %v2351_v39 }
 0x127   : > { %810 = vmatmul.mubr.bf16.gmra.mrb[4].mxu0 %v651_v11  ;;  %v370_v17 = vpop.xlane.xlu1 %369  ;;  %v587_v19 = vmul.f32 %v1698_v2, %v569_v7  ;;  %v611_v21 = vmul.f32 %v2327_v59, %v586_v12 }
 0x128   : > { %v536_v22 = vadd.f32 1e-05, %v518_v8  ;;  %v519_v23 = vmax.f32 %v501_v35, 0.0  ;;  %v484_v25 = vmul.f32 %v2368_v15, %v2368_v15  ;;  %819 = vmatprep.mubr.bf16.mxu0 %v1960_v42  ;;  %v2374_v9 = vmul.f32 0.0078125, %v370_v17 }
 0x129   : > { %v441_v44 = vpop.xlane.xlu0 %440  ;;  %v612_v27 = vmul.f32 %v2327_v59, %v587_v19  ;;  %v636_v33 = vadd.f32 %v2338_v13, %v611_v21  ;;  %v573_v8 = vsub.f32 %v2250_v26, %v2357_v5 }
 0x12a   : > { %1703 = vrsqrt.f32 %v536_v22  ;;  %v537_v28 = vadd.f32 1e-05, %v519_v23  ;;  %v466_v29 = vmul.f32 0.0078125, %v441_v44  ;;  %v485_v38 = vmul.f32 %v2374_v9, %v2374_v9 }
 0x12b   : > { %v443_v31 = vpop.xlane.xlu1 %442  ;;  %v637_v36 = vadd.f32 %v2338_v13, %v612_v27 }
 0x12c   : > { %v1700_v37 = vpop.eup %1699  ;;  %1705 = vrsqrt.f32 %v537_v28  ;;  %v502_v4 = vsub.f32 %v466_v29, %v484_v25  ;;  %v467_v14 = vmul.f32 0.0078125, %v443_v31 }
 0x12d   : > { %v372_v47 = vpop.xlane.xlu0 %371  ;;  %v652_v48 = vpack.c.bf16 %v637_v36, %v636_v33  ;;  %v588_v51 = vmul.f32 %v1700_v37, %v570_v30  ;;  %v574_v36 = vsub.f32 %v2259_v32, %v2368_v15 }
 0x12e   : > { %v1702_v52 = vpop.eup %1701  ;;  %v520_v16 = vmax.f32 %v502_v4, 0.0  ;;  %v503_v63 = vsub.f32 %v467_v14, %v485_v38  ;;  %v2385_v53 = vmul.f32 0.0078125, %v372_v47 }
 0x12f   : > { %820 = vmatmul.mubr.bf16.gmra.mrb[8].mxu0 %v652_v48  ;;  %v374_v20 = vpop.xlane.xlu1 %373  ;;  %v589_v54 = vmul.f32 %v1702_v52, %v571_v43  ;;  %v613_v55 = vmul.f32 %v2327_v59, %v588_v51  ;;  %v575_v51 = vsub.f32 %v2262_v34, %v2374_v9 }
 0x130   : > { %v538_v56 = vadd.f32 1e-05, %v520_v16  ;;  %v521_v57 = vmax.f32 %v503_v63, 0.0  ;;  %v486_v0 = vmul.f32 %v2385_v53, %v2385_v53  ;;  %829 = vmatprep.mubr.bf16.mxu0 %v1960_v42  ;;  %v2391_v18 = vmul.f32 0.0078125, %v374_v20 }
 0x131   : > { %v445_v1 = vpop.xlane.xlu0 %444  ;;  %v614_v58 = vmul.f32 %v2327_v59, %v589_v54  ;;  %v638_v6 = vadd.f32 %v2338_v13, %v613_v55 }
 0x132   : > { %1707 = vrsqrt.f32 %v538_v56  ;;  %v539_v60 = vadd.f32 1e-05, %v521_v57  ;;  %v468_v61 = vmul.f32 0.0078125, %v445_v1  ;;  %v487_v11 = vmul.f32 %v2391_v18, %v2391_v18 }
 0x133   : > { %v447_v3 = vpop.xlane.xlu1 %446  ;;  %v639_v7 = vadd.f32 %v2338_v13, %v614_v58 }
 0x134   : > { %v1704_v10 = vpop.eup %1703  ;;  %1709 = vrsqrt.f32 %v539_v60  ;;  %v504_v12 = vsub.f32 %v468_v61, %v486_v0  ;;  %v469_v2 = vmul.f32 0.0078125, %v447_v3  ;;  %v576_v3 = vsub.f32 %v2271_v40, %v2385_v53 }
 0x135   : > { %v376_v35 = vpop.xlane.xlu0 %375  ;;  %v653_v17 = vpack.c.bf16 %v639_v7, %v638_v6  ;;  %v590_v19 = vmul.f32 %v1704_v10, %v572_v62 }
 0x136   : > { %v1706_v21 = vpop.eup %1705  ;;  %v522_v24 = vmax.f32 %v504_v12, 0.0  ;;  %v505_v39 = vsub.f32 %v469_v2, %v487_v11  ;;  %v2402_v22 = vmul.f32 0.0078125, %v376_v35  ;;  %v577_v35 = vsub.f32 %v2274_v41, %v2391_v18 }
 0x137   : > { %830 = vmatmul.mubr.bf16.gmra.mrb[12].mxu0 %v653_v17  ;;  %v378_v23 = vpop.xlane.xlu1 %377  ;;  %v591_v25 = vmul.f32 %v1706_v21, %v573_v8  ;;  %v615_v44 = vmul.f32 %v2327_v59, %v590_v19 }
 0x138   : > { %v540_v27 = vadd.f32 1e-05, %v522_v24  ;;  %v523_v28 = vmax.f32 %v505_v39, 0.0  ;;  %v488_v29 = vmul.f32 %v2402_v22, %v2402_v22  ;;  %839 = vmatprep.mubr.bf16.mxu0 %v1960_v42  ;;  %v2408_v26 = vmul.f32 0.0078125, %v378_v23 }
 0x139   : > { %v449_v5 = vpop.xlane.xlu0 %448  ;;  %v616_v30 = vmul.f32 %v2327_v59, %v591_v25  ;;  %v640_v38 = vadd.f32 %v2338_v13, %v615_v44  ;;  %v578_v41 = vsub.f32 %v2284_v45, %v2402_v22 }
 0x13a   : > { %1711 = vrsqrt.f32 %v540_v27  ;;  %v541_v31 = vadd.f32 1e-05, %v523_v28  ;;  %v470_v33 = vmul.f32 0.0078125, %v449_v5  ;;  %v489_v43 = vmul.f32 %v2408_v26, %v2408_v26 }
 0x13b   : > { %v451_v37 = vpop.xlane.xlu1 %450  ;;  %v641_v4 = vadd.f32 %v2338_v13, %v616_v30  ;;  %v579_v5 = vsub.f32 %v2287_v46, %v2408_v26 }
 0x13c   : > { %v1708_v14 = vpop.eup %1707  ;;  %1713 = vrsqrt.f32 %v541_v31  ;;  %v506_v47 = vsub.f32 %v470_v33, %v488_v29  ;;  %v471_v48 = vmul.f32 0.0078125, %v451_v37 }
 0x13d   : > { %v380_v52 = vpop.xlane.xlu0 %379  ;;  %v654_v16 = vpack.c.bf16 %v641_v4, %v640_v38  ;;  %v592_v63 = vmul.f32 %v1708_v14, %v574_v36 }
 0x13e   : > { %v1710_v20 = vpop.eup %1709  ;;  %v524_v32 = vmax.f32 %v506_v47, 0.0  ;;  %v507_v15 = vsub.f32 %v471_v48, %v489_v43  ;;  %v400_v54 = vmul.f32 0.0078125, %v380_v52 }
 0x13f   : > { %840 = vmatmul.mubr.bf16.gmra.mrb[16].mxu0 %v654_v16  ;;  %v382_v55 = vpop.xlane.xlu1 %381  ;;  %v593_v56 = vmul.f32 %v1710_v20, %v575_v51  ;;  %v617_v57 = vmul.f32 %v2327_v59, %v592_v63  ;;  %v1675_v20 = vld [vmem:[#allocation7 + $0x50] sm:$0xff]  }
 0x140   : > { %v542_v0 = vadd.f32 1e-05, %v524_v32  ;;  %v525_v1 = vmax.f32 %v507_v15, 0.0  ;;  %v490_v58 = vmul.f32 %v400_v54, %v400_v54  ;;  %849 = vmatprep.mubr.bf16.mxu0 %v1960_v42  ;;  %v401_v60 = vmul.f32 0.0078125, %v382_v55  ;;  %v1676_v32 = vld [vmem:[#allocation7 + $0x10] sm:$0xff]   ;;  %1505 = vmatprep.subr.bf16.mxu1 %v1675_v20  ;;  %v1678_v15 = vld [vmem:[#allocation7 + $0x18] sm:$0xff]  }
 0x141   : > { %v453_v61 = vpop.xlane.xlu0 %452  ;;  %v618_v34 = vmul.f32 %v2327_v59, %v593_v56  ;;  %v642_v7 = vadd.f32 %v2338_v13, %v617_v57  ;;  %v580_v22 = vsub.f32 %v2296_v49, %v400_v54  ;;  %1506 = vmatpush3.bf16.msra.mxu1 %v1676_v32  ;;  %v1679_v54 = vld [vmem:[#allocation7 + $0x60] sm:$0xff]   ;;  %v1683_v56 = vld [vmem:[#allocation7 + $0x70] sm:$0xff]   ;;  %v1685_v57 = vld [vmem:[#allocation7 + $0x78] sm:$0xff]  }
 0x142   : > { %1715 = vrsqrt.f32 %v542_v0  ;;  %v543_v9 = vadd.f32 1e-05, %v525_v1  ;;  %v472_v62 = vmul.f32 0.0078125, %v453_v61  ;;  %v491_v12 = vmul.f32 %v401_v60, %v401_v60  ;;  %v1680_v55 = vld [vmem:[#allocation7 + $0x20] sm:$0xff]   ;;  %v1686_v0 = vld [vmem:[#allocation7 + $0x38] sm:$0xff]  }
 0x143   : > { %v455_v6 = vpop.xlane.xlu1 %454  ;;  %v643_v10 = vadd.f32 %v2338_v13, %v618_v34  ;;  %v581_v46 = vsub.f32 %v2299_v50, %v401_v60  ;;  %v1677_v50 = vld [vmem:[#allocation7 + $0x58] sm:$0xff]   ;;  %v677_v1 = vlaneseq  ;;  %v675_v61 = vld [vmem:[%s2664_s4] sm:$0x3] }
 0x144   : > { %v1712_v11 = vpop.eup %1711  ;;  %1717 = vrsqrt.f32 %v543_v9  ;;  %v508_v2 = vsub.f32 %v472_v62, %v490_v58  ;;  %v473_v8 = vmul.f32 0.0078125, %v455_v6  ;;  %1507 = vmatprep.subr.bf16.mxu1 %v1677_v50 }
 0x145   : > { %v655_v17 = vpack.c.bf16 %v643_v10, %v642_v7  ;;  %v594_v19 = vmul.f32 %v1712_v11, %v576_v3  ;;  %1508 = vmatpush3.bf16.msra.mxu1 %v1678_v15  ;;  %v678_v58 = vshrl.u32 %v677_v1, 7 }
 0x146   : > { %v1714_v21 = vpop.eup %1713  ;;  %v526_v24 = vmax.f32 %v508_v2, 0.0  ;;  %v509_v39 = vsub.f32 %v473_v8, %v491_v12  ;;  %1509 = vmatprep.subr.bf16.mxu1 %v1679_v54 }
 0x147   : > { %850 = vmatmul.mubr.bf16.gmra.mrb[20].mxu0 %v655_v17  ;;  %v595_v40 = vmul.f32 %v1714_v21, %v577_v35  ;;  %v619_v53 = vmul.f32 %v2327_v59, %v594_v19  ;;  %v679_v60 = vsub.s32 0, %v678_v58  ;;  %v683_v34 = vsub.s32 1, %v678_v58 }
 0x148   : > { %v544_v23 = vadd.f32 1e-05, %v526_v24  ;;  %v527_v25 = vmax.f32 %v509_v39, 0.0  ;;  %859 = vmatprep.mubr.bf16.mxu0 %v1960_v42 }
 0x149   : > { %v620_v44 = vmul.f32 %v2327_v59, %v595_v40  ;;  %v644_v18 = vadd.f32 %v2338_v13, %v619_v53  ;;  %1510 = vmatpush3.bf16.msra.mxu1 %v1680_v55  ;;  %v2452_v9 = vrot.slane %v675_v61, %v679_v60  ;;  %v2454_v62 = vrot.slane %v675_v61, %v683_v34 }
 0x14a   : > { %1719 = vrsqrt.f32 %v544_v23  ;;  %v545_v27 = vadd.f32 1e-05, %v527_v25 }
 0x14b   : > { %v645_v28 = vadd.f32 %v2338_v13, %v620_v44 }
 0x14c   : > { %v1716_v29 = vpop.eup %1715  ;;  %1721 = vrsqrt.f32 %v545_v27 }
 0x14d   : > { %v656_v30 = vpack.c.bf16 %v645_v28, %v644_v18  ;;  %v596_v31 = vmul.f32 %v1716_v29, %v578_v41 }
 0x14e   : > { %v1718_v33 = vpop.eup %1717 }
 0x14f   : > { %860 = vmatmul.mubr.bf16.gmra.mrb[24].mxu0 %v656_v30  ;;  %v597_v36 = vmul.f32 %v1718_v33, %v579_v5  ;;  %v621_v37 = vmul.f32 %v2327_v59, %v596_v31 }
 0x150   : > { %869 = vmatprep.mubr.bf16.mxu0 %v1960_v42 }
 0x151   : > { %v622_v45 = vmul.f32 %v2327_v59, %v597_v36  ;;  %v646_v38 = vadd.f32 %v2338_v13, %v621_v37 }
 0x153   : > { %v647_v4 = vadd.f32 %v2338_v13, %v622_v45 }
 0x154   : > { %v1720_v14 = vpop.eup %1719 }
 0x155   : > { %v657_v26 = vpack.c.bf16 %v647_v4, %v646_v38  ;;  %v598_v43 = vmul.f32 %v1720_v14, %v580_v22 }
 0x156   : > { %v1722_v47 = vpop.eup %1721 }
 0x157   : > { %870 = vmatmul.mubr.bf16.gmra.mrb[28].mxu0 %v657_v26  ;;  %v599_v48 = vmul.f32 %v1722_v47, %v581_v46  ;;  %v623_v51 = vmul.f32 %v2327_v59, %v598_v43 }
 0x158   : > { %879 = vmatprep.mubr.bf16.mxu0 %v1960_v42  ;;  %v1681_v42 = vld [vmem:[#allocation7 + $0x68] sm:$0xff]  }
 0x159   : > { %v624_v52 = vmul.f32 %v2327_v59, %v599_v48  ;;  %v648_v49 = vadd.f32 %v2338_v13, %v623_v51  ;;  %v1682_v59 = vld [vmem:[#allocation7 + $0x28] sm:$0xff]   ;;  %1511 = vmatprep.subr.bf16.mxu1 %v1681_v42 }
 0x15a   : > { %1512 = vmatpush3.bf16.msra.mxu1 %v1682_v59 }
 0x15b   : > { %v649_v16 = vadd.f32 %v2338_v13, %v624_v52  ;;  %v1684_v13 = vld [vmem:[#allocation7 + $0x30] sm:$0xff]   ;;  %1513 = vmatprep.subr.bf16.mxu1 %v1683_v56 }
 0x15d   : > { %v658_v63 = vpack.c.bf16 %v649_v16, %v648_v49 }
 0x15e   : > { %1514 = vmatpush3.bf16.msra.mxu1 %v1684_v13 }
 0x15f   : > { %880 = vmatmul.mubr.bf16.gmra.mrb[32].mxu0 %v658_v63  ;;  %1515 = vmatprep.subr.bf16.mxu1 %v1685_v57 }
 0x162   : > { %1516 = vmatpush3.bf16.msra.mxu1 %v1686_v0 }
 0x1f2   : > { %v801_v3 = vpop.f32.mrb[0].mxu0 }
 0x1f3   : > { %v802_v6 = vadd.f32 %v801_v3, %v2452_v9  ;;  %v803_v7 = vpop.f32.mrb[1].mxu0 }
 0x1f4   : > { %v804_v10 = vadd.f32 %v803_v7, %v2454_v62  ;;  %v805_v11 = vpop.f32.mrb[2].mxu0 }
 0x1f5   : > { %v926_v12 = vmul.f32 0.70710677, %v802_v6  ;;  %v806_v2 = vadd.f32 %v805_v11, %v2452_v9  ;;  %v807_v8 = vpop.f32.mrb[3].mxu0  ;;  %v890_v36 = vmul.f32 0.5, %v802_v6 }
 0x1f6   : > { %v927_v35 = vmul.f32 0.70710677, %v804_v10  ;;  %v808_v17 = vadd.f32 %v807_v8, %v2454_v62  ;;  %v891_v47 = vmul.f32 0.5, %v804_v10 }
 0x1f7   : > { %1723 = verf.f32 %v926_v12  ;;  %v928_v19 = vmul.f32 0.70710677, %v806_v2  ;;  %v892_v4 = vmul.f32 0.5, %v806_v2 }
 0x1f8   : > { %1725 = verf.f32 %v927_v35  ;;  %v929_v21 = vmul.f32 0.70710677, %v808_v17  ;;  %v893_v63 = vmul.f32 0.5, %v808_v17 }
 0x1f9   : > { %1727 = verf.f32 %v928_v19 }
 0x1fa   : > { %1729 = verf.f32 %v929_v21  ;;  %v811_v24 = vpop.f32.mrb[4].mxu0 }
 0x1fb   : > { %v812_v39 = vadd.f32 %v811_v24, %v2452_v9  ;;  %v813_v40 = vpop.f32.mrb[5].mxu0 }
 0x1fc   : > { %v814_v53 = vadd.f32 %v813_v40, %v2454_v62  ;;  %v815_v23 = vpop.f32.mrb[6].mxu0 }
 0x1fd   : > { %v930_v25 = vmul.f32 0.70710677, %v812_v39  ;;  %v816_v44 = vadd.f32 %v815_v23, %v2452_v9  ;;  %v817_v27 = vpop.f32.mrb[7].mxu0  ;;  %v894_v6 = vmul.f32 0.5, %v812_v39 }
 0x1fe   : > { %v931_v41 = vmul.f32 0.70710677, %v814_v53  ;;  %v818_v18 = vadd.f32 %v817_v27, %v2454_v62  ;;  %v895_v2 = vmul.f32 0.5, %v814_v53 }
 0x1ff   : > { %1731 = verf.f32 %v930_v25  ;;  %v932_v28 = vmul.f32 0.70710677, %v816_v44  ;;  %v896_v7 = vmul.f32 0.5, %v816_v44 }
 0x200   : > { %1733 = verf.f32 %v931_v41  ;;  %v933_v29 = vmul.f32 0.70710677, %v818_v18  ;;  %v897_v8 = vmul.f32 0.5, %v818_v18 }
 0x201   : > { %v1724_v5 = vpop.eup %1723  ;;  %1735 = verf.f32 %v932_v28 }
 0x202   : > { %v1726_v30 = vpop.eup %1725  ;;  %1737 = verf.f32 %v933_v29  ;;  %v821_v31 = vpop.f32.mrb[8].mxu0  ;;  %v998_v37 = vadd.f32 1.0, %v1724_v5 }
 0x203   : > { %v1728_v33 = vpop.eup %1727  ;;  %v2465_v45 = vadd.f32 %v821_v31, %v2452_v9  ;;  %v823_v22 = vpop.f32.mrb[9].mxu0  ;;  %v999_v43 = vadd.f32 1.0, %v1726_v30 }
 0x204   : > { %v1730_v38 = vpop.eup %1729  ;;  %v1000_v14 = vadd.f32 1.0, %v1728_v33  ;;  %v2468_v46 = vadd.f32 %v823_v22, %v2454_v62  ;;  %v825_v26 = vpop.f32.mrb[10].mxu0  ;;  %v1034_v50 = vmul.f32 %v998_v37, %v890_v36 }
 0x205   : > { %v934_v48 = vmul.f32 0.70710677, %v2465_v45  ;;  %v2472_v51 = vadd.f32 %v825_v26, %v2452_v9  ;;  %v827_v52 = vpop.f32.mrb[11].mxu0  ;;  %v1001_v49 = vadd.f32 1.0, %v1730_v38  ;;  %v1035_v55 = vmul.f32 %v999_v43, %v891_v47 }
 0x206   : > { %v1036_v16 = vmul.f32 %v1000_v14, %v892_v4  ;;  %v935_v20 = vmul.f32 0.70710677, %v2468_v46  ;;  %v2476_v32 = vadd.f32 %v827_v52, %v2454_v62  ;;  %v898_v38 = vmul.f32 0.5, %v2465_v45 }
 0x207   : > { %1739 = verf.f32 %v934_v48  ;;  %v936_v15 = vmul.f32 0.70710677, %v2472_v51  ;;  %v1037_v42 = vmul.f32 %v1001_v49, %v893_v63  ;;  %v900_v4 = vmul.f32 0.5, %v2472_v51 }
 0x208   : > { %1741 = verf.f32 %v935_v20  ;;  %v937_v54 = vmul.f32 0.70710677, %v2476_v32  ;;  %v1070_v56 = vpack.c.bf16 %v1036_v16, %v1034_v50  ;;  %v899_v47 = vmul.f32 0.5, %v2468_v46 }
 0x209   : > { %v1732_v59 = vpop.eup %1731  ;;  %1743 = verf.f32 %v936_v15  ;;  %v1071_v1 = vpack.c.bf16 %v1037_v42, %v1035_v55  ;;  %v901_v48 = vmul.f32 0.5, %v2476_v32 }
 0x20a   : > { %v1734_v13 = vpop.eup %1733  ;;  %v1002_v57 = vadd.f32 1.0, %v1732_v59  ;;  %1745 = verf.f32 %v937_v54  ;;  %v831_v0 = vpop.f32.mrb[12].mxu0 }
 0x20b   : > { %v1736_v58 = vpop.eup %1735  ;;  %v1003_v60 = vadd.f32 1.0, %v1734_v13  ;;  %v2481_v61 = vadd.f32 %v831_v0, %v2452_v9  ;;  %v833_v34 = vpop.f32.mrb[13].mxu0  ;;  %1255 = vmatprep.mubr.bf16.mxu1 %v1071_v1 }
 0x20c   : > { %v1738_v3 = vpop.eup %1737  ;;  %v1004_v10 = vadd.f32 1.0, %v1736_v58  ;;  %v2484_v11 = vadd.f32 %v833_v34, %v2454_v62  ;;  %v835_v12 = vpop.f32.mrb[14].mxu0  ;;  %1256 = vmatmul.mubr.bf16.vlgmr.msra.gmra.mrb[0].mxu1 %v1070_v56  ;;  %v1038_v21 = vmul.f32 %v1002_v57, %v894_v6 }
 0x20d   : > { %v1005_v35 = vadd.f32 1.0, %v1738_v3  ;;  %v938_v17 = vmul.f32 0.70710677, %v2481_v61  ;;  %v837_v19 = vpop.f32.mrb[15].mxu0  ;;  %v836_v39 = vadd.f32 %v835_v12, %v2452_v9  ;;  %v1039_v23 = vmul.f32 %v1003_v60, %v895_v2 }
 0x20e   : > { %v1040_v24 = vmul.f32 %v1004_v10, %v896_v7  ;;  %v939_v40 = vmul.f32 0.70710677, %v2484_v11  ;;  %v838_v44 = vadd.f32 %v837_v19, %v2454_v62  ;;  %v902_v60 = vmul.f32 0.5, %v2481_v61 }
 0x20f   : > { %v1041_v25 = vmul.f32 %v1005_v35, %v897_v8  ;;  %1747 = verf.f32 %v938_v17  ;;  %v940_v27 = vmul.f32 0.70710677, %v836_v39  ;;  %v903_v10 = vmul.f32 0.5, %v2484_v11 }
 0x210   : > { %1749 = verf.f32 %v939_v40  ;;  %v1072_v53 = vpack.c.bf16 %v1040_v24, %v1038_v21  ;;  %v941_v18 = vmul.f32 0.70710677, %v838_v44  ;;  %v904_v12 = vmul.f32 0.5, %v836_v39 }
 0x211   : > { %v1740_v41 = vpop.eup %1739  ;;  %v1073_v28 = vpack.c.bf16 %v1041_v25, %v1039_v23  ;;  %1751 = verf.f32 %v940_v27  ;;  %v905_v17 = vmul.f32 0.5, %v838_v44 }
 0x212   : > { %v1742_v29 = vpop.eup %1741  ;;  %v1006_v5 = vadd.f32 1.0, %v1740_v41  ;;  %v841_v30 = vpop.f32.mrb[16].mxu0  ;;  %1753 = verf.f32 %v941_v18 }
 0x213   : > { %v1744_v31 = vpop.eup %1743  ;;  %v1007_v33 = vadd.f32 1.0, %v1742_v29  ;;  %v2491_v36 = vadd.f32 %v841_v30, %v2452_v9  ;;  %v843_v37 = vpop.f32.mrb[17].mxu0  ;;  %1263 = vmatprep.mubr.bf16.mxu1 %v1073_v28 }
 0x214   : > { %v1746_v22 = vpop.eup %1745  ;;  %v1008_v14 = vadd.f32 1.0, %v1744_v31  ;;  %v2496_v26 = vadd.f32 %v843_v37, %v2454_v62  ;;  %v845_v43 = vpop.f32.mrb[18].mxu0  ;;  %1264 = vmatmul.mubr.bf16.gmra.mrb[4].mxu1 %v1072_v53  ;;  %v1042_v63 = vmul.f32 %v1006_v5, %v898_v38 }
 0x215   : > { %v1009_v52 = vadd.f32 1.0, %v1746_v22  ;;  %v942_v49 = vmul.f32 0.70710677, %v2491_v36  ;;  %v847_v16 = vpop.f32.mrb[19].mxu0  ;;  %v846_v51 = vadd.f32 %v845_v43, %v2452_v9  ;;  %v1043_v50 = vmul.f32 %v1007_v33, %v899_v47 }
 0x216   : > { %v1044_v20 = vmul.f32 %v1008_v14, %v900_v4  ;;  %v943_v45 = vmul.f32 0.70710677, %v2496_v26  ;;  %v848_v54 = vadd.f32 %v847_v16, %v2454_v62  ;;  %v906_v33 = vmul.f32 0.5, %v2491_v36 }
 0x217   : > { %v1045_v15 = vmul.f32 %v1009_v52, %v901_v48  ;;  %1755 = verf.f32 %v942_v49  ;;  %v944_v46 = vmul.f32 0.70710677, %v846_v51  ;;  %v907_v14 = vmul.f32 0.5, %v2496_v26 }
 0x218   : > { %1757 = verf.f32 %v943_v45  ;;  %v1074_v55 = vpack.c.bf16 %v1044_v20, %v1042_v63  ;;  %v945_v42 = vmul.f32 0.70710677, %v848_v54  ;;  %v908_v43 = vmul.f32 0.5, %v846_v51 }
 0x219   : > { %v1748_v32 = vpop.eup %1747  ;;  %v1075_v59 = vpack.c.bf16 %v1045_v15, %v1043_v50  ;;  %1759 = verf.f32 %v944_v46  ;;  %v909_v49 = vmul.f32 0.5, %v848_v54 }
 0x21a   : > { %v1750_v56 = vpop.eup %1749  ;;  %v851_v13 = vpop.f32.mrb[20].mxu0  ;;  %v1010_v57 = vadd.f32 1.0, %v1748_v32  ;;  %1761 = verf.f32 %v945_v42 }
 0x21b   : > { %v2505_v0 = vadd.f32 %v851_v13, %v2452_v9  ;;  %v853_v1 = vpop.f32.mrb[21].mxu0  ;;  %1271 = vmatprep.mubr.bf16.mxu1 %v1075_v59  ;;  %v1752_v58 = vpop.eup %1751  ;;  %v1011_v34 = vadd.f32 1.0, %v1750_v56 }
 0x21c   : > { %v2509_v3 = vadd.f32 %v853_v1, %v2454_v62  ;;  %v855_v6 = vpop.f32.mrb[22].mxu0  ;;  %v1754_v7 = vpop.eup %1753  ;;  %v1012_v2 = vadd.f32 1.0, %v1752_v58  ;;  %1272 = vmatmul.mubr.bf16.gmra.mrb[8].mxu1 %v1074_v55  ;;  %v1046_v24 = vmul.f32 %v1010_v57, %v902_v60 }
 0x21d   : > { %v946_v8 = vmul.f32 0.70710677, %v2505_v0  ;;  %v857_v35 = vpop.f32.mrb[23].mxu0  ;;  %v1013_v19 = vadd.f32 1.0, %v1754_v7  ;;  %v2515_v61 = vadd.f32 %v855_v6, %v2452_v9  ;;  %v1047_v11 = vmul.f32 %v1011_v34, %v903_v10 }
 0x21e   : > { %v947_v21 = vmul.f32 0.70710677, %v2509_v3  ;;  %v1048_v40 = vmul.f32 %v1012_v2, %v904_v12  ;;  %v2518_v23 = vadd.f32 %v857_v35, %v2454_v62  ;;  %v910_v58 = vmul.f32 0.5, %v2505_v0 }
 0x21f   : > { %1763 = verf.f32 %v946_v8  ;;  %v1049_v39 = vmul.f32 %v1013_v19, %v905_v17  ;;  %v948_v25 = vmul.f32 0.70710677, %v2515_v61  ;;  %v911_v10 = vmul.f32 0.5, %v2509_v3 }
 0x220   : > { %1765 = verf.f32 %v947_v21  ;;  %v949_v44 = vmul.f32 0.70710677, %v2518_v23  ;;  %v1076_v53 = vpack.c.bf16 %v1048_v40, %v1046_v24  ;;  %v912_v12 = vmul.f32 0.5, %v2515_v61 }
 0x221   : > { %v1756_v27 = vpop.eup %1755  ;;  %1767 = verf.f32 %v948_v25  ;;  %v1077_v28 = vpack.c.bf16 %v1049_v39, %v1047_v11  ;;  %v913_v17 = vmul.f32 0.5, %v2518_v23 }
 0x222   : > { %v1758_v41 = vpop.eup %1757  ;;  %v861_v18 = vpop.f32.mrb[24].mxu0  ;;  %v1014_v29 = vadd.f32 1.0, %v1756_v27  ;;  %1769 = verf.f32 %v949_v44 }
 0x223   : > { %v2523_v5 = vadd.f32 %v861_v18, %v2452_v9  ;;  %v863_v30 = vpop.f32.mrb[25].mxu0  ;;  %v1760_v31 = vpop.eup %1759  ;;  %v1015_v37 = vadd.f32 1.0, %v1758_v41  ;;  %1279 = vmatprep.mubr.bf16.mxu1 %v1077_v28 }
 0x224   : > { %v2527_v22 = vadd.f32 %v863_v30, %v2454_v62  ;;  %v865_v38 = vpop.f32.mrb[26].mxu0  ;;  %v1762_v4 = vpop.eup %1761  ;;  %v1016_v47 = vadd.f32 1.0, %v1760_v31  ;;  %1280 = vmatmul.mubr.bf16.gmra.mrb[12].mxu1 %v1076_v53  ;;  %v1050_v20 = vmul.f32 %v1014_v29, %v906_v33 }
 0x225   : > { %v950_v48 = vmul.f32 0.70710677, %v2523_v5  ;;  %v867_v52 = vpop.f32.mrb[27].mxu0  ;;  %v1017_v16 = vadd.f32 1.0, %v1762_v4  ;;  %v2533_v36 = vadd.f32 %v865_v38, %v2452_v9  ;;  %v1051_v26 = vmul.f32 %v1015_v37, %v907_v14 }
 0x226   : > { %v951_v63 = vmul.f32 0.70710677, %v2527_v22  ;;  %v1052_v45 = vmul.f32 %v1016_v47, %v908_v43  ;;  %v2536_v50 = vadd.f32 %v867_v52, %v2454_v62  ;;  %v914_v31 = vmul.f32 0.5, %v2523_v5 }
 0x227   : > { %1771 = verf.f32 %v950_v48  ;;  %v1053_v51 = vmul.f32 %v1017_v16, %v909_v49  ;;  %v952_v15 = vmul.f32 0.70710677, %v2533_v36  ;;  %v915_v14 = vmul.f32 0.5, %v2527_v22 }
 0x228   : > { %1773 = verf.f32 %v951_v63  ;;  %v953_v54 = vmul.f32 0.70710677, %v2536_v50  ;;  %v1078_v55 = vpack.c.bf16 %v1052_v45, %v1050_v20  ;;  %v916_v43 = vmul.f32 0.5, %v2533_v36 }
 0x229   : > { %v1764_v46 = vpop.eup %1763  ;;  %1775 = verf.f32 %v952_v15  ;;  %v1079_v59 = vpack.c.bf16 %v1053_v51, %v1051_v26  ;;  %v917_v49 = vmul.f32 0.5, %v2536_v50 }
 0x22a   : > { %v1766_v32 = vpop.eup %1765  ;;  %v871_v42 = vpop.f32.mrb[28].mxu0  ;;  %v1018_v56 = vadd.f32 1.0, %v1764_v46  ;;  %1777 = verf.f32 %v953_v54 }
 0x22b   : > { %v2541_v13 = vadd.f32 %v871_v42, %v2452_v9  ;;  %v873_v57 = vpop.f32.mrb[29].mxu0  ;;  %v1768_v1 = vpop.eup %1767  ;;  %v1019_v60 = vadd.f32 1.0, %v1766_v32  ;;  %1287 = vmatprep.mubr.bf16.mxu1 %v1079_v59 }
 0x22c   : > { %v2545_v34 = vadd.f32 %v873_v57, %v2454_v62  ;;  %v875_v6 = vpop.f32.mrb[30].mxu0  ;;  %v1770_v7 = vpop.eup %1769  ;;  %v1020_v2 = vadd.f32 1.0, %v1768_v1  ;;  %1288 = vmatmul.mubr.bf16.gmra.mrb[16].mxu1 %v1078_v55  ;;  %v1054_v24 = vmul.f32 %v1018_v56, %v910_v58 }
 0x22d   : > { %v954_v8 = vmul.f32 0.70710677, %v2541_v13  ;;  %v877_v35 = vpop.f32.mrb[31].mxu0  ;;  %v1021_v19 = vadd.f32 1.0, %v1770_v7  ;;  %v876_v21 = vadd.f32 %v875_v6, %v2452_v9  ;;  %v1055_v3 = vmul.f32 %v1019_v60, %v911_v10 }
 0x22e   : > { %v955_v0 = vmul.f32 0.70710677, %v2545_v34  ;;  %v1056_v40 = vmul.f32 %v1020_v2, %v912_v12  ;;  %v878_v11 = vadd.f32 %v877_v35, %v2454_v62  ;;  %v918_v56 = vmul.f32 0.5, %v2541_v13 }
 0x22f   : > { %1779 = verf.f32 %v954_v8  ;;  %v1057_v39 = vmul.f32 %v1021_v19, %v913_v17  ;;  %v956_v61 = vmul.f32 0.70710677, %v876_v21  ;;  %v920_v57 = vmul.f32 0.5, %v876_v21 }
 0x230   : > { %1781 = verf.f32 %v955_v0  ;;  %v957_v27 = vmul.f32 0.70710677, %v878_v11  ;;  %v1080_v44 = vpack.c.bf16 %v1056_v40, %v1054_v24  ;;  %v919_v1 = vmul.f32 0.5, %v2545_v34 }
 0x231   : > { %v1772_v25 = vpop.eup %1771  ;;  %1783 = verf.f32 %v956_v61  ;;  %v1081_v41 = vpack.c.bf16 %v1057_v39, %v1055_v3  ;;  %v921_v58 = vmul.f32 0.5, %v878_v11 }
 0x232   : > { %v1774_v53 = vpop.eup %1773  ;;  %v881_v23 = vpop.f32.mrb[32].mxu0  ;;  %v1022_v18 = vadd.f32 1.0, %v1772_v25  ;;  %1785 = verf.f32 %v957_v27 }
 0x233   : > { %v882_v28 = vadd.f32 %v881_v23, %v2452_v9  ;;  %v883_v29 = vpop.f32.mrb[33].mxu0  ;;  %v1776_v30 = vpop.eup %1775  ;;  %v1023_v33 = vadd.f32 1.0, %v1774_v53  ;;  %1295 = vmatprep.mubr.bf16.mxu1 %v1081_v41 }
 0x234   : > { %v884_v37 = vadd.f32 %v883_v29, %v2454_v62  ;;  %v885_v38 = vpop.f32.mrb[34].mxu0  ;;  %v1778_v4 = vpop.eup %1777  ;;  %v1024_v47 = vadd.f32 1.0, %v1776_v30  ;;  %1296 = vmatmul.mubr.bf16.gmra.mrb[20].mxu1 %v1080_v44  ;;  %v1058_v20 = vmul.f32 %v1022_v18, %v914_v31  ;;  %v2567_v18 = vld [vmem:[%s2666_s6] ss:$0 sm:$0xff] }
 0x235   : > { %v958_v48 = vmul.f32 0.70710677, %v882_v28  ;;  %v887_v52 = vpop.f32.mrb[35].mxu0  ;;  %v1025_v16 = vadd.f32 1.0, %v1778_v4  ;;  %v886_v5 = vadd.f32 %v885_v38, %v2452_v9  ;;  %v1059_v51 = vmul.f32 %v1023_v33, %v915_v14 }
 0x236   : > { %v959_v63 = vmul.f32 0.70710677, %v884_v37  ;;  %v1060_v45 = vmul.f32 %v1024_v47, %v916_v43  ;;  %v888_v26 = vadd.f32 %v887_v52, %v2454_v62  ;;  %v922_v21 = vmul.f32 0.5, %v882_v28 }
 0x237   : > { %1787 = verf.f32 %v958_v48  ;;  %v1061_v15 = vmul.f32 %v1025_v16, %v917_v49  ;;  %v960_v22 = vmul.f32 0.70710677, %v886_v5  ;;  %v924_v40 = vmul.f32 0.5, %v886_v5 }
 0x238   : > { %1789 = verf.f32 %v959_v63  ;;  %v961_v46 = vmul.f32 0.70710677, %v888_v26  ;;  %v1082_v54 = vpack.c.bf16 %v1060_v45, %v1058_v20  ;;  %v923_v34 = vmul.f32 0.5, %v884_v37 }
 0x239   : > { %v1780_v36 = vpop.eup %1779  ;;  %1791 = verf.f32 %v960_v22  ;;  %v1083_v32 = vpack.c.bf16 %v1061_v15, %v1059_v51  ;;  %v925_v11 = vmul.f32 0.5, %v888_v26 }
 0x23a   : > { %v1782_v55 = vpop.eup %1781  ;;  %v1026_v50 = vadd.f32 1.0, %v1780_v36  ;;  %1793 = verf.f32 %v961_v46 }
 0x23b   : > { %v1784_v42 = vpop.eup %1783  ;;  %v1027_v59 = vadd.f32 1.0, %v1782_v55  ;;  %1303 = vmatprep.mubr.bf16.mxu1 %v1083_v32 }
 0x23c   : > { %v1786_v9 = vpop.eup %1785  ;;  %v1028_v62 = vadd.f32 1.0, %v1784_v42  ;;  %1304 = vmatmul.mubr.bf16.gmra.mrb[24].mxu1 %v1082_v54  ;;  %v1062_v6 = vmul.f32 %v1026_v50, %v918_v56 }
 0x23d   : > { %v1029_v60 = vadd.f32 1.0, %v1786_v9  ;;  %v1063_v10 = vmul.f32 %v1027_v59, %v919_v1 }
 0x23e   : > { %v1064_v7 = vmul.f32 %v1028_v62, %v920_v57 }
 0x23f   : > { %v1065_v12 = vmul.f32 %v1029_v60, %v921_v58 }
 0x240   : > { %v1084_v8 = vpack.c.bf16 %v1064_v7, %v1062_v6 }
 0x241   : > { %v1788_v2 = vpop.eup %1787  ;;  %v1085_v17 = vpack.c.bf16 %v1065_v12, %v1063_v10 }
 0x242   : > { %v1790_v35 = vpop.eup %1789  ;;  %v1030_v19 = vadd.f32 1.0, %v1788_v2 }
 0x243   : > { %v1792_v0 = vpop.eup %1791  ;;  %v1031_v24 = vadd.f32 1.0, %v1790_v35  ;;  %1311 = vmatprep.mubr.bf16.mxu1 %v1085_v17 }
 0x244   : > { %v1794_v13 = vpop.eup %1793  ;;  %v1032_v3 = vadd.f32 1.0, %v1792_v0  ;;  %1312 = vmatmul.mubr.bf16.gmra.mrb[28].mxu1 %v1084_v8  ;;  %v1066_v61 = vmul.f32 %v1030_v19, %v922_v21 }
 0x245   : > { %v1033_v39 = vadd.f32 1.0, %v1794_v13  ;;  %v1067_v27 = vmul.f32 %v1031_v24, %v923_v34 }
 0x246   : > { %v1068_v25 = vmul.f32 %v1032_v3, %v924_v40 }
 0x247   : > { %v1069_v44 = vmul.f32 %v1033_v39, %v925_v11 }
 0x248   : > { %v1086_v53 = vpack.c.bf16 %v1068_v25, %v1066_v61 }
 0x249   : > { %v1087_v23 = vpack.c.bf16 %v1069_v44, %v1067_v27 }
 0x24b   : > { %1319 = vmatprep.mubr.bf16.mxu1 %v1087_v23 }
 0x24c   : > { %1320 = vmatmul.mubr.bf16.gmra.mrb[32].mxu1 %v1086_v53 }
 0x2df   : > { %v1517_v41 = vpop.f32.mrb[0].mxu1 }
 0x2e0   : > { %v1518_v28 = vpop.f32.mrb[1].mxu1 }
 0x2e1   : > { %v1519_v29 = vadd.f32 %v1518_v28, %v1517_v41  ;;  %v1520_v30 = vpop.f32.mrb[2].mxu1 }
 0x2e2   : > { %v1521_v31 = vpop.f32.mrb[3].mxu1 }
 0x2e3   : > { %v1258_v33 = vadd.f32 %v1519_v29, %v2567_v18  ;;  %v1522_v37 = vadd.f32 %v1521_v31, %v1520_v30 }
 0x2e5   : > { %1328 = vst [vmem:[%s2572_s3] sm:$0xff] %v1258_v33  ;;  %v1261_v38 = vadd.f32 %v1522_v37, %v2567_v18 }
 0x2e7   : > { %1329 = vst [vmem:[%s2572_s3 + $0x8] sm:$0xff] %v1261_v38  ;;  %v1523_v4 = vpop.f32.mrb[4].mxu1 }
 0x2e8   : > { %v1524_v14 = vpop.f32.mrb[5].mxu1 }
 0x2e9   : > { %v1525_v43 = vadd.f32 %v1524_v14, %v1523_v4  ;;  %v1526_v47 = vpop.f32.mrb[6].mxu1 }
 0x2ea   : > { %v1527_v48 = vpop.f32.mrb[7].mxu1 }
 0x2eb   : > { %v1266_v52 = vadd.f32 %v1525_v43, %v2567_v18  ;;  %v1528_v49 = vadd.f32 %v1527_v48, %v1526_v47 }
 0x2ed   : > { %1330 = vst [vmem:[%s2572_s3 + $0x10] sm:$0xff] %v1266_v52  ;;  %v1269_v16 = vadd.f32 %v1528_v49, %v2567_v18 }
 0x2ef   : > { %1331 = vst [vmem:[%s2572_s3 + $0x18] sm:$0xff] %v1269_v16  ;;  %v1529_v63 = vpop.f32.mrb[8].mxu1 }
 0x2f0   : > { %v1530_v5 = vpop.f32.mrb[9].mxu1 }
 0x2f1   : > { %v1531_v20 = vadd.f32 %v1530_v5, %v1529_v63  ;;  %v1532_v45 = vpop.f32.mrb[10].mxu1 }
 0x2f2   : > { %v1533_v26 = vpop.f32.mrb[11].mxu1 }
 0x2f3   : > { %v1274_v51 = vadd.f32 %v1531_v20, %v2567_v18  ;;  %v1534_v15 = vadd.f32 %v1533_v26, %v1532_v45 }
 0x2f5   : > { %1332 = vst [vmem:[%s2572_s3 + $0x20] sm:$0xff] %v1274_v51  ;;  %v1277_v22 = vadd.f32 %v1534_v15, %v2567_v18 }
 0x2f7   : > { %1333 = vst [vmem:[%s2572_s3 + $0x28] sm:$0xff] %v1277_v22  ;;  %v1535_v36 = vpop.f32.mrb[12].mxu1 }
 0x2f8   : > { %v1536_v46 = vpop.f32.mrb[13].mxu1 }
 0x2f9   : > { %v1537_v54 = vadd.f32 %v1536_v46, %v1535_v36  ;;  %v1538_v55 = vpop.f32.mrb[14].mxu1 }
 0x2fa   : > { %v1539_v32 = vpop.f32.mrb[15].mxu1 }
 0x2fb   : > { %v1282_v50 = vadd.f32 %v1537_v54, %v2567_v18  ;;  %v1540_v42 = vadd.f32 %v1539_v32, %v1538_v55 }
 0x2fd   : > { %1334 = vst [vmem:[%s2572_s3 + $0x30] sm:$0xff] %v1282_v50  ;;  %v1285_v59 = vadd.f32 %v1540_v42, %v2567_v18 }
 0x2ff   : > { %1335 = vst [vmem:[%s2572_s3 + $0x38] sm:$0xff] %v1285_v59  ;;  %v1541_v9 = vpop.f32.mrb[16].mxu1 }
 0x300   : > { %v1542_v56 = vpop.f32.mrb[17].mxu1 }
 0x301   : > { %v1543_v57 = vadd.f32 %v1542_v56, %v1541_v9  ;;  %v1544_v62 = vpop.f32.mrb[18].mxu1 }
 0x302   : > { %v1545_v1 = vpop.f32.mrb[19].mxu1 }
 0x303   : > { %v1290_v58 = vadd.f32 %v1543_v57, %v2567_v18  ;;  %v1546_v60 = vadd.f32 %v1545_v1, %v1544_v62 }
 0x305   : > { %1336 = vst [vmem:[%s2572_s3 + $0x40] sm:$0xff] %v1290_v58  ;;  %v1293_v6 = vadd.f32 %v1546_v60, %v2567_v18 }
 0x307   : > { %1337 = vst [vmem:[%s2572_s3 + $0x48] sm:$0xff] %v1293_v6  ;;  %v1547_v7 = vpop.f32.mrb[20].mxu1 }
 0x308   : > { %v1548_v10 = vpop.f32.mrb[21].mxu1 }
 0x309   : > { %v1549_v12 = vadd.f32 %v1548_v10, %v1547_v7  ;;  %v1550_v2 = vpop.f32.mrb[22].mxu1 }
 0x30a   : > { %v1551_v8 = vpop.f32.mrb[23].mxu1 }
 0x30b   : > { %v1298_v35 = vadd.f32 %v1549_v12, %v2567_v18  ;;  %v1552_v17 = vadd.f32 %v1551_v8, %v1550_v2 }
 0x30d   : > { %1338 = vst [vmem:[%s2572_s3 + $0x50] sm:$0xff] %v1298_v35  ;;  %v1301_v19 = vadd.f32 %v1552_v17, %v2567_v18 }
 0x30f   : > { %1339 = vst [vmem:[%s2572_s3 + $0x58] sm:$0xff] %v1301_v19  ;;  %v1553_v0 = vpop.f32.mrb[24].mxu1 }
 0x310   : > { %v1554_v24 = vpop.f32.mrb[25].mxu1 }
 0x311   : > { %v1555_v13 = vadd.f32 %v1554_v24, %v1553_v0  ;;  %v1556_v21 = vpop.f32.mrb[26].mxu1 }
 0x312   : > { %v1557_v40 = vpop.f32.mrb[27].mxu1 }
 0x313   : > { %v1306_v3 = vadd.f32 %v1555_v13, %v2567_v18  ;;  %v1558_v34 = vadd.f32 %v1557_v40, %v1556_v21 }
 0x315   : > { %1340 = vst [vmem:[%s2572_s3 + $0x60] sm:$0xff] %v1306_v3  ;;  %v1309_v11 = vadd.f32 %v1558_v34, %v2567_v18 }
 0x317   : > { %1341 = vst [vmem:[%s2572_s3 + $0x68] sm:$0xff] %v1309_v11  ;;  %v1559_v39 = vpop.f32.mrb[28].mxu1 }
 0x318   : > { %v1560_v61 = vpop.f32.mrb[29].mxu1 }
 0x319   : > { %v1561_v25 = vadd.f32 %v1560_v61, %v1559_v39  ;;  %v1562_v27 = vpop.f32.mrb[30].mxu1 }
 0x31a   : > { %v1563_v44 = vpop.f32.mrb[31].mxu1 }
 0x31b   : > { %v1314_v53 = vadd.f32 %v1561_v25, %v2567_v18  ;;  %v1564_v23 = vadd.f32 %v1563_v44, %v1562_v27 }
 0x31d   : > { %1342 = vst [vmem:[%s2572_s3 + $0x70] sm:$0xff] %v1314_v53  ;;  %v1317_v41 = vadd.f32 %v1564_v23, %v2567_v18 }
 0x31f   : > { %1343 = vst [vmem:[%s2572_s3 + $0x78] sm:$0xff] %v1317_v41  ;;  %v1565_v28 = vpop.f32.mrb[32].mxu1 }
 0x320   : > { %v1566_v29 = vpop.f32.mrb[33].mxu1 }
 0x321   : > { %v1567_v30 = vadd.f32 %v1566_v29, %v1565_v28  ;;  %v1568_v31 = vpop.f32.mrb[34].mxu1 }
 0x322   : > { %v1569_v33 = vpop.f32.mrb[35].mxu1 }
 0x323   : > { %v1322_v37 = vadd.f32 %v1567_v30, %v2567_v18  ;;  %v1570_v38 = vadd.f32 %v1569_v33, %v1568_v31 }
 0x325   : > { %1344 = vst [vmem:[%s2572_s3 + $0x80] sm:$0xff] %v1322_v37  ;;  %v1325_v4 = vadd.f32 %v1570_v38, %v2567_v18 }
 0x327   : > { %1345 = vst [vmem:[%s2572_s3 + $0x88] sm:$0xff] %v1325_v4 }
 0x328   : > { %1894 = shalt.err (!%p1891_p1)
}
 0x329   : > { %s1895_s18 = scalar_lea.hbm %s2611_s11, 2304  ;;  %s1899_s15 = scalar_lea.hbm %s2667_s7, 4608 }
 0x32a   : > { %p1896_p13 = scmp.ne.s32.totalorder %s2611_s11, %s1895_s18  ;;  %p1900_p4 = scmp.lt.u32.totalorder %s2611_s11, %s2667_s7 }
 0x32b   : > { %p1901_p7 = scmp.lt.u32.totalorder %s1899_s15, %s1895_s18  ;;  %p1903_p11 = scmp.lt.u32.totalorder %s1895_s18, %s2611_s11 }
 0x32c   : > { %p1897_p6 = pnand %p1896_p13, %p2687_p0 }
 0x32d   : > { %p1902_p8 = por %p1901_p7, %p1900_p4 }
 0x32e   : > { %p1898_p10 = pneg %p1897_p6 }
 0x32f   : > { %p1904_p2 = por %p1903_p11, %p1902_p8 }
 0x331   : > { %p1905_p3 = pnand %p1904_p2, %p1898_p10 }
 0x333   : > { %1908 = shalt.err (!%p1905_p3)
}
 0x334   : > { %s1962_s22 = smov 128   ;;  %s1963_s10 = smov 8  }
 0x335   : > { %1583 = dma.vmem_to_hbm [thread:$0]  (%p2687_p0), %s2613_s29, 2304, %s2611_s11, %s1347_s28, %s1962_s22, %s1962_s22, %s1963_s10  }
 0x336 PF: > { %s1375_s30 = sand.u32 1, %s1939_s24   ;;  %p2688_p5 = scmp.ne.s32.totalorder %s2675_s8, 0 }
 0x337   : > { %p2689_p9 = scmp.ge.s32.totalorder %s1951_s27, 2  ;;  %s1376_s9 = scalar_lea.sflag [#allocation4], %s1375_s30 }
 0x339   : > { %p1597_p12 = pnand %p2689_p9, %p2688_p5 }
 0x33b   : > { %1934 = dma.done.wait (!%p1597_p12), %s1376_s9, 2304  }
 0x33c   : > { %1936 = vsyncadd (!%p1597_p12), %s1376_s9, 4294964992  ;;  %p21_p1 = scmp.ge.s32.totalorder %s2117_s16, 4   ;;  %s2690_s24 = smov %s1943_s25 }
 0x33d   : > { %s2691_s25 = smov %s1947_s26  ;;  %s2692_s26 = smov %s2126_s19 }
 0x33e   : > { %s2693_s27 = smov %s2117_s16  ;;  %23 = sbr.rel (!%p21_p1) target bundleno = 8 (0x8), region = 101 }
 0x345   :  { %1381 = vsyncpa [#allocation3], 1 }
 0x346   :  { %1383 = vsyncpa [#allocation3 + $0x1], 1 }
 0x347   :  { %1384 = vsyncpa [#allocation6], 1 }
 0x348   :  { %1385 = vsyncpa [#allocation4], 1 }
 0x349   :  { %1387 = vsyncpa [#allocation4 + $0x1], 1 }

</bundles_post_ra>
